<compile_context>
chip_gen: v5e
topology: v5e:2x2
jax: 0.10.0
libtpu: 0.0.40
codegen_flags: <defaults>
</compile_context>

<pallas_src>
import functools
import math

import jax
import jax.numpy as jnp
from jax.experimental import pallas as pl
from jax.experimental.pallas import tpu as pltpu


# ----------------------------------------------------------------------------
# Kernel helpers
# ----------------------------------------------------------------------------
def _layer_norm(x, gamma, beta, eps=1e-5):
    mu = jnp.mean(x, axis=-1, keepdims=True)
    var = jnp.mean((x - mu) ** 2, axis=-1, keepdims=True)
    return (x - mu) * jax.lax.rsqrt(var + eps) * gamma + beta


# ----------------------------------------------------------------------------
# Fused kernel: embedding + all encoder layers + final projection
# grid = (batch, layer); activation carried in VMEM scratch across layers.
# ----------------------------------------------------------------------------
def _fused_encoder_kernel(
        # inputs
        src_ref, pe_ref, mask_ref, emb_w_ref, emb_b_ref,
        g1_ref, be1_ref,
        wq_ref, bq_ref, wk_ref, bk_ref, wv_ref, bv_ref,
        wo_ref, bo_ref,
        g2_ref, be2_ref,
        w1_ref, b1_ref, w2_ref, b2_ref,
        out_w_ref, out_b_ref,
        # outputs
        o_ref,
        # scratch
        x_scr,
        *, scale):
    l = pl.program_id(1)
    n_layers = pl.num_programs(1)
    S, D = x_scr.shape
    H = wq_ref.shape[1]
    Dh = D // H

    # ---- first layer iteration: embedding * sqrt(D) + positional encoding ----
    @pl.when(l == 0)
    def _():
        x0 = src_ref[0].astype(jnp.bfloat16)                       # (S, D)
        y = jnp.dot(x0, emb_w_ref[...], preferred_element_type=jnp.float32)
        x_scr[...] = (y + emb_b_ref[...]) * scale + pe_ref[...]

    x = x_scr[...]                                                  # (S, D) f32

    # ---- pre-norm multi-head self-attention (heads batched) ----
    h = _layer_norm(x, g1_ref[0], be1_ref[0])
    hb = jnp.broadcast_to(h.astype(jnp.bfloat16)[None], (H, S, D))  # (H, S, D)

    q = jnp.einsum('hsd,hde->hse', hb, wq_ref[0],
                   preferred_element_type=jnp.float32) + bq_ref[0]  # (H, S, Dh)
    k = jnp.einsum('hsd,hde->hse', hb, wk_ref[0],
                   preferred_element_type=jnp.float32) + bk_ref[0]
    v = jnp.einsum('hsd,hde->hse', hb, wv_ref[0],
                   preferred_element_type=jnp.float32) + bv_ref[0]

    inv_sqrt_dh = 1.0 / math.sqrt(Dh)
    scores = jnp.einsum('hqe,hke->hqk',
                        q.astype(jnp.bfloat16), k.astype(jnp.bfloat16),
                        preferred_element_type=jnp.float32) * inv_sqrt_dh
    scores = scores + mask_ref[...][None, :, :]                     # causal bias
    m = jnp.max(scores, axis=-1, keepdims=True)
    p = jnp.exp(scores - m)
    denom = jnp.sum(p, axis=-1, keepdims=True)
    p = p * pl.reciprocal(denom, approx=True)

    ctx = jnp.einsum('hqk,hke->hqe',
                     p.astype(jnp.bfloat16), v.astype(jnp.bfloat16),
                     preferred_element_type=jnp.float32)            # (H, S, Dh)
    attn = jnp.einsum('hse,hed->hsd',
                      ctx.astype(jnp.bfloat16), wo_ref[0],
                      preferred_element_type=jnp.float32)           # (H, S, D)
    attn = jnp.sum(attn, axis=0) + bo_ref[0]                        # (S, D)
    x = x + attn

    # ---- pre-norm feed-forward ----
    h2 = _layer_norm(x, g2_ref[0], be2_ref[0])
    ff = jnp.dot(h2.astype(jnp.bfloat16), w1_ref[0],
                 preferred_element_type=jnp.float32) + b1_ref[0]
    ff = jnp.maximum(ff, 0.0)
    ff = jnp.dot(ff.astype(jnp.bfloat16), w2_ref[0],
                 preferred_element_type=jnp.float32) + b2_ref[0]
    x = x + ff
    x_scr[...] = x

    # ---- last layer iteration: project only the decoder-length rows ----
    @pl.when(l == n_layers - 1)
    def _():
        s_dec = o_ref.shape[1]
        xd = x[:s_dec, :].astype(jnp.bfloat16)
        y = jnp.dot(xd, out_w_ref[...], preferred_element_type=jnp.float32)
        o_ref[0] = y + out_b_ref[...]


# ----------------------------------------------------------------------------
# Parameters / positional encoding (host-side glue, plain JAX)
# ----------------------------------------------------------------------------
def make_positional_encoding(max_len, d_model):
    pos = jnp.arange(max_len, dtype=jnp.float32)[:, None]
    div = jnp.exp(jnp.arange(0, d_model, 2, dtype=jnp.float32)
                  * (-math.log(10000.0) / d_model))
    pe = jnp.zeros((max_len, d_model), jnp.float32)
    pe = pe.at[:, 0::2].set(jnp.sin(pos * div))
    pe = pe.at[:, 1::2].set(jnp.cos(pos * div))
    return pe


def make_params(key, D, Ddec, num_heads, num_layers, d_ff):
    """Stacked (leading-L) per-layer params; matmul weights in bf16,
    Q/K/V/O weights pre-split head-major for batched attention."""
    H = num_heads
    Dh = D // H
    keys = jax.random.split(key, 3 + num_layers)
    initrange = 0.2

    emb_w = jax.random.uniform(keys[0], (D, D), jnp.float32, -initrange, initrange)
    emb_b = jax.random.uniform(keys[1], (1, D), jnp.float32,
                               -1.0 / math.sqrt(D), 1.0 / math.sqrt(D))
    out_w = 0.2 * jax.random.normal(keys[2], (D, Ddec), jnp.float32)
    out_b = jnp.zeros((1, Ddec), jnp.float32)

    names = ['g1', 'be1', 'wq', 'bq', 'wk', 'bk', 'wv', 'bv',
             'wo', 'bo', 'g2', 'be2', 'w1', 'b1', 'w2', 'b2']
    layers = {n: [] for n in names}

    def heads_out(w):       # (D, D) in->out  ->  (H, D, Dh)
        return w.reshape(D, H, Dh).transpose(1, 0, 2)

    for li in range(num_layers):
        lk = jax.random.split(keys[3 + li], 10)
        s_d = 1.0 / math.sqrt(D)
        s_ff = 1.0 / math.sqrt(d_ff)

        wqkv = jax.random.uniform(lk[2], (D, 3 * D), jnp.float32, -s_d, s_d)
        layers['wq'].append(heads_out(wqkv[:, 0:D]))
        layers['wk'].append(heads_out(wqkv[:, D:2 * D]))
        layers['wv'].append(heads_out(wqkv[:, 2 * D:3 * D]))
        bz = jnp.zeros((H, 1, Dh), jnp.float32)
        layers['bq'].append(bz)
        layers['bk'].append(bz)
        layers['bv'].append(bz)

        wo = jax.random.uniform(lk[3], (D, D), jnp.float32, -s_d, s_d)
        layers['wo'].append(wo.reshape(H, Dh, D))      # head-major output proj
        layers['bo'].append(jnp.zeros((1, D), jnp.float32))

        layers['g1'].append(1.0 + 0.1 * jax.random.normal(lk[0], (1, D), jnp.float32))
        layers['be1'].append(0.1 * jax.random.normal(lk[1], (1, D), jnp.float32))
        layers['g2'].append(1.0 + 0.1 * jax.random.normal(lk[4], (1, D), jnp.float32))
        layers['be2'].append(0.1 * jax.random.normal(lk[5], (1, D), jnp.float32))

        layers['w1'].append(jax.random.uniform(lk[6], (D, d_ff), jnp.float32, -s_d, s_d))
        layers['b1'].append(jax.random.uniform(lk[7], (1, d_ff), jnp.float32, -s_d, s_d))
        layers['w2'].append(jax.random.uniform(lk[8], (d_ff, D), jnp.float32, -s_ff, s_ff))
        layers['b2'].append(jax.random.uniform(lk[9], (1, D), jnp.float32, -s_ff, s_ff))

    params = {'emb_w': emb_w.astype(jnp.bfloat16), 'emb_b': emb_b,
              'out_w': out_w.astype(jnp.bfloat16), 'out_b': out_b}
    matmul_weights = {'wq', 'wk', 'wv', 'wo', 'w1', 'w2'}
    for n in names:
        stacked = jnp.stack(layers[n], axis=0)
        if n in matmul_weights:
            stacked = stacked.astype(jnp.bfloat16)
        params[n] = stacked
    return params


# ----------------------------------------------------------------------------
# Forward wrapper (single fused pallas_call)
# ----------------------------------------------------------------------------
def transformer_encoder_forward(src, params, pe, *, seq_len_decoder):
    B, S, D = src.shape
    L = params['wq'].shape[0]
    Ddec = params['out_w'].shape[1]
    scale = math.sqrt(D)

    # causal additive mask (finite large negative for robustness)
    row = jax.lax.broadcasted_iota(jnp.int32, (S, S), 0)
    col = jax.lax.broadcasted_iota(jnp.int32, (S, S), 1)
    mask = jnp.where(row >= col, 0.0, -1e30).astype(jnp.float32)

    pe_s = pe[:S, :D].astype(jnp.float32)

    def _const2(shape):
        return pl.BlockSpec(shape, lambda b, l: (0, 0))

    def _per_layer(arr):
        zeros = (0,) * (arr.ndim - 1)
        return pl.BlockSpec((1,) + arr.shape[1:], lambda b, l: (l,) + zeros)

    layer_names = ['g1', 'be1', 'wq', 'bq', 'wk', 'bk', 'wv', 'bv',
                   'wo', 'bo', 'g2', 'be2', 'w1', 'b1', 'w2', 'b2']

    inputs = ([src, pe_s, mask, params['emb_w'], params['emb_b']]
              + [params[n] for n in layer_names]
              + [params['out_w'], params['out_b']])

    in_specs = ([pl.BlockSpec((1, S, D), lambda b, l: (b, 0, 0)),
                 _const2((S, D)), _const2((S, S)),
                 _const2((D, D)), _const2((1, D))]
                + [_per_layer(params[n]) for n in layer_names]
                + [_const2((D, Ddec)), _const2((1, Ddec))])

    out = pl.pallas_call(
        functools.partial(_fused_encoder_kernel, scale=scale),
        grid=(B, L),
        in_specs=in_specs,
        out_specs=pl.BlockSpec((1, seq_len_decoder, Ddec), lambda b, l: (b, 0, 0)),
        out_shape=jax.ShapeDtypeStruct((B, seq_len_decoder, Ddec), jnp.float32),
        scratch_shapes=[pltpu.VMEM((S, D), jnp.float32)],
        compiler_params=pltpu.CompilerParams(
            dimension_semantics=("parallel", "arbitrary"),
            vmem_limit_bytes=48 * 1024 * 1024),
    )(*inputs)
    return out


# ----------------------------------------------------------------------------
if __name__ == "__main__":
    B = 2
    seq_len_encoder = 8
    seq_len_decoder = 4
    dim_encoder = 32
    dim_decoder = 16
    num_heads = 4
    num_layers = 2
    d_ff = 64

    key = jax.random.PRNGKey(0)
    kx, kp = jax.random.split(key)
    src = jax.random.normal(kx, (B, seq_len_encoder, dim_encoder), jnp.float32)

    params = make_params(kp, dim_encoder, dim_decoder, num_heads, num_layers, d_ff)
    pe = make_positional_encoding(max(seq_len_encoder, seq_len_decoder), dim_encoder)

    out = transformer_encoder_forward(src, params, pe,
                                      seq_len_decoder=seq_len_decoder)
    out = jax.block_until_ready(out)

    assert out.shape == (B, seq_len_decoder, dim_decoder), out.shape
    assert bool(jnp.all(jnp.isfinite(out)))
    print("KERNEL_OK")
</pallas_src>

<mosaic_0001>
module attributes {stable_mosaic.version = 11 : i64} {
  func.func @_fused_encoder_kernel(%arg0: i32, %arg1: i32, %arg2: memref<1x8x32xf32, #tpu.memory_space<vmem>>, %arg3: memref<8x32xf32, #tpu.memory_space<vmem>>, %arg4: memref<8x8xf32, #tpu.memory_space<vmem>>, %arg5: memref<32x32xbf16, #tpu.memory_space<vmem>>, %arg6: memref<1x32xf32, #tpu.memory_space<vmem>>, %arg7: memref<1x1x32xf32, #tpu.memory_space<vmem>>, %arg8: memref<1x1x32xf32, #tpu.memory_space<vmem>>, %arg9: memref<1x4x32x8xbf16, #tpu.memory_space<vmem>>, %arg10: memref<1x4x1x8xf32, #tpu.memory_space<vmem>>, %arg11: memref<1x4x32x8xbf16, #tpu.memory_space<vmem>>, %arg12: memref<1x4x1x8xf32, #tpu.memory_space<vmem>>, %arg13: memref<1x4x32x8xbf16, #tpu.memory_space<vmem>>, %arg14: memref<1x4x1x8xf32, #tpu.memory_space<vmem>>, %arg15: memref<1x4x8x32xbf16, #tpu.memory_space<vmem>>, %arg16: memref<1x1x32xf32, #tpu.memory_space<vmem>>, %arg17: memref<1x1x32xf32, #tpu.memory_space<vmem>>, %arg18: memref<1x1x32xf32, #tpu.memory_space<vmem>>, %arg19: memref<1x32x64xbf16, #tpu.memory_space<vmem>>, %arg20: memref<1x1x64xf32, #tpu.memory_space<vmem>>, %arg21: memref<1x64x32xbf16, #tpu.memory_space<vmem>>, %arg22: memref<1x1x32xf32, #tpu.memory_space<vmem>>, %arg23: memref<32x16xbf16, #tpu.memory_space<vmem>>, %arg24: memref<1x16xf32, #tpu.memory_space<vmem>>, %arg25: memref<1x4x16xf32, #tpu.memory_space<vmem>>, %arg26: memref<8x32xf32, #tpu.memory_space<vmem>>) attributes {dimension_semantics = [#tpu.dimension_semantics<parallel>, #tpu.dimension_semantics<arbitrary>], iteration_bounds = array<i64: 2, 2>, scalar_prefetch = 0 : i64, scratch_operands = 1 : i64, tpu.core_type = #tpu.core_type<tc>, window_params = [{transform_indices = @transform_0, window_bounds = array<i64: 1, 8, 32>}, {pipeline_mode = #tpu.pipeline_mode<synchronous>, transform_indices = @transform_1, window_bounds = array<i64: 8, 32>}, {pipeline_mode = #tpu.pipeline_mode<synchronous>, transform_indices = @transform_2, window_bounds = array<i64: 8, 8>}, {pipeline_mode = #tpu.pipeline_mode<synchronous>, transform_indices = @transform_3, window_bounds = array<i64: 32, 32>}, {pipeline_mode = #tpu.pipeline_mode<synchronous>, transform_indices = @transform_4, window_bounds = array<i64: 1, 32>}, {transform_indices = @transform_5, window_bounds = array<i64: 1, 1, 32>}, {transform_indices = @transform_6, window_bounds = array<i64: 1, 1, 32>}, {transform_indices = @transform_7, window_bounds = array<i64: 1, 4, 32, 8>}, {transform_indices = @transform_8, window_bounds = array<i64: 1, 4, 1, 8>}, {transform_indices = @transform_9, window_bounds = array<i64: 1, 4, 32, 8>}, {transform_indices = @transform_10, window_bounds = array<i64: 1, 4, 1, 8>}, {transform_indices = @transform_11, window_bounds = array<i64: 1, 4, 32, 8>}, {transform_indices = @transform_12, window_bounds = array<i64: 1, 4, 1, 8>}, {transform_indices = @transform_13, window_bounds = array<i64: 1, 4, 8, 32>}, {transform_indices = @transform_14, window_bounds = array<i64: 1, 1, 32>}, {transform_indices = @transform_15, window_bounds = array<i64: 1, 1, 32>}, {transform_indices = @transform_16, window_bounds = array<i64: 1, 1, 32>}, {transform_indices = @transform_17, window_bounds = array<i64: 1, 32, 64>}, {transform_indices = @transform_18, window_bounds = array<i64: 1, 1, 64>}, {transform_indices = @transform_19, window_bounds = array<i64: 1, 64, 32>}, {transform_indices = @transform_20, window_bounds = array<i64: 1, 1, 32>}, {pipeline_mode = #tpu.pipeline_mode<synchronous>, transform_indices = @transform_21, window_bounds = array<i64: 32, 16>}, {pipeline_mode = #tpu.pipeline_mode<synchronous>, transform_indices = @transform_22, window_bounds = array<i64: 1, 16>}, {transform_indices = @transform_23, window_bounds = array<i64: 1, 4, 16>}]} {
    %c0_i32 = arith.constant 0 : i32
    %0 = arith.cmpi eq, %arg1, %c0_i32 : i32
    %1 = arith.extui %0 : i1 to i32
    %c0_i32_0 = arith.constant 0 : i32
    %2 = arith.cmpi ne, %1, %c0_i32_0 : i32
    scf.if %2 {
      %c0_84 = arith.constant 0 : index
      %c0_85 = arith.constant 0 : index
      %c0_86 = arith.constant 0 : index
      %136 = vector.load %arg2[%c0_84, %c0_85, %c0_86] : memref<1x8x32xf32, #tpu.memory_space<vmem>>, vector<1x8x32xf32>
      %137 = vector.shape_cast %136 : vector<1x8x32xf32> to vector<8x32xf32>
      %138 = arith.truncf %137 : vector<8x32xf32> to vector<8x32xbf16>
      %c0_87 = arith.constant 0 : index
      %c0_88 = arith.constant 0 : index
      %139 = vector.load %arg5[%c0_87, %c0_88] : memref<32x32xbf16, #tpu.memory_space<vmem>>, vector<32x32xbf16>
      %cst_89 = arith.constant dense<0.000000e+00> : vector<8x32xf32>
      %140 = tpu.matmul %138, %139, %cst_89 {dimension_numbers = #tpu.dot_dimension_numbers<[1], [0], [0], [1], [0, 0, 1, 1], [], []>} : vector<8x32xbf16>, vector<32x32xbf16>, vector<8x32xf32> -> vector<8x32xf32>
      %c0_90 = arith.constant 0 : index
      %c0_91 = arith.constant 0 : index
      %141 = vector.load %arg6[%c0_90, %c0_91] : memref<1x32xf32, #tpu.memory_space<vmem>>, vector<1x32xf32>
      %142 = vector.broadcast %141 : vector<1x32xf32> to vector<8x32xf32>
      %143 = arith.addf %140, %142 : vector<8x32xf32>
      %cst_92 = arith.constant 5.65685415 : f32
      %144 = vector.broadcast %cst_92 : f32 to vector<8x32xf32>
      %145 = arith.mulf %143, %144 : vector<8x32xf32>
      %c0_93 = arith.constant 0 : index
      %c0_94 = arith.constant 0 : index
      %146 = vector.load %arg3[%c0_93, %c0_94] : memref<8x32xf32, #tpu.memory_space<vmem>>, vector<8x32xf32>
      %147 = arith.addf %145, %146 : vector<8x32xf32>
      %c0_95 = arith.constant 0 : index
      %c0_96 = arith.constant 0 : index
      %148 = vector.load %arg26[%c0_95, %c0_96] : memref<8x32xf32, #tpu.memory_space<vmem>>, vector<8x32xf32>
      tpu.vector_store %arg26[%c0_95, %c0_96], %147 {strides = array<i32>} : memref<8x32xf32, #tpu.memory_space<vmem>>, vector<8x32xf32>,
    } else {
    }
    %c0 = arith.constant 0 : index
    %c0_1 = arith.constant 0 : index
    %3 = vector.load %arg26[%c0, %c0_1] : memref<8x32xf32, #tpu.memory_space<vmem>>, vector<8x32xf32>
    %c0_2 = arith.constant 0 : index
    %c0_3 = arith.constant 0 : index
    %c0_4 = arith.constant 0 : index
    %4 = vector.load %arg7[%c0_2, %c0_3, %c0_4] : memref<1x1x32xf32, #tpu.memory_space<vmem>>, vector<1x1x32xf32>
    %5 = vector.shape_cast %4 : vector<1x1x32xf32> to vector<1x32xf32>
    %c0_5 = arith.constant 0 : index
    %c0_6 = arith.constant 0 : index
    %c0_7 = arith.constant 0 : index
    %6 = vector.load %arg8[%c0_5, %c0_6, %c0_7] : memref<1x1x32xf32, #tpu.memory_space<vmem>>, vector<1x1x32xf32>
    %7 = vector.shape_cast %6 : vector<1x1x32xf32> to vector<1x32xf32>
    %cst = arith.constant dense<0.000000e+00> : vector<8xf32>
    %8 = vector.multi_reduction <add>, %3, %cst [1] : vector<8x32xf32> to vector<8xf32>
    %9 = vector.shape_cast %8 : vector<8xf32> to vector<8x1xf32>
    %cst_8 = arith.constant 3.200000e+01 : f32
    %10 = vector.broadcast %cst_8 : f32 to vector<8x1xf32>
    %11 = arith.divf %9, %10 : vector<8x1xf32>
    %12 = vector.broadcast %11 : vector<8x1xf32> to vector<8x32xf32>
    %13 = arith.subf %3, %12 : vector<8x32xf32>
    %14 = arith.mulf %13, %13 : vector<8x32xf32>
    %cst_9 = arith.constant dense<0.000000e+00> : vector<8xf32>
    %15 = vector.multi_reduction <add>, %14, %cst_9 [1] : vector<8x32xf32> to vector<8xf32>
    %16 = vector.shape_cast %15 : vector<8xf32> to vector<8x1xf32>
    %cst_10 = arith.constant 3.200000e+01 : f32
    %17 = vector.broadcast %cst_10 : f32 to vector<8x1xf32>
    %18 = arith.divf %16, %17 : vector<8x1xf32>
    %19 = vector.broadcast %11 : vector<8x1xf32> to vector<8x32xf32>
    %20 = arith.subf %3, %19 : vector<8x32xf32>
    %cst_11 = arith.constant 9.99999974E-6 : f32
    %21 = vector.broadcast %cst_11 : f32 to vector<8x1xf32>
    %22 = arith.addf %18, %21 : vector<8x1xf32>
    %23 = math.rsqrt %22 : vector<8x1xf32>
    %24 = vector.broadcast %23 : vector<8x1xf32> to vector<8x32xf32>
    %25 = arith.mulf %20, %24 : vector<8x32xf32>
    %26 = vector.broadcast %5 : vector<1x32xf32> to vector<8x32xf32>
    %27 = arith.mulf %25, %26 : vector<8x32xf32>
    %28 = vector.broadcast %7 : vector<1x32xf32> to vector<8x32xf32>
    %29 = arith.addf %27, %28 : vector<8x32xf32>
    %30 = arith.truncf %29 : vector<8x32xf32> to vector<8x32xbf16>
    %31 = vector.shape_cast %30 : vector<8x32xbf16> to vector<1x8x32xbf16>
    %32 = vector.shape_cast %31 : vector<1x8x32xbf16> to vector<1x8x32xbf16>
    %33 = vector.broadcast %32 : vector<1x8x32xbf16> to vector<4x8x32xbf16>
    %c0_12 = arith.constant 0 : index
    %c0_13 = arith.constant 0 : index
    %c0_14 = arith.constant 0 : index
    %c0_15 = arith.constant 0 : index
    %34 = vector.load %arg9[%c0_12, %c0_13, %c0_14, %c0_15] : memref<1x4x32x8xbf16, #tpu.memory_space<vmem>>, vector<1x4x32x8xbf16>
    %35 = vector.shape_cast %34 : vector<1x4x32x8xbf16> to vector<4x32x8xbf16>
    "tpu.trace_start"() <{level = 10 : i32, message = "hsd,hde->hse"}> : () -> ()
    %cst_16 = arith.constant dense<0.000000e+00> : vector<4x8x8xf32>
    %36 = tpu.matmul %33, %35, %cst_16 {dimension_numbers = #tpu.dot_dimension_numbers<[2], [1], [1], [2], [0, 0, 0, 1, 1, 2], [0], [0]>} : vector<4x8x32xbf16>, vector<4x32x8xbf16>, vector<4x8x8xf32> -> vector<4x8x8xf32>
    "tpu.trace_stop"() : () -> ()
    %c0_17 = arith.constant 0 : index
    %c0_18 = arith.constant 0 : index
    %c0_19 = arith.constant 0 : index
    %c0_20 = arith.constant 0 : index
    %37 = vector.load %arg10[%c0_17, %c0_18, %c0_19, %c0_20] : memref<1x4x1x8xf32, #tpu.memory_space<vmem>>, vector<1x4x1x8xf32>
    %38 = vector.shape_cast %37 : vector<1x4x1x8xf32> to vector<4x1x8xf32>
    %39 = vector.broadcast %38 : vector<4x1x8xf32> to vector<4x8x8xf32>
    %40 = arith.addf %36, %39 : vector<4x8x8xf32>
    %c0_21 = arith.constant 0 : index
    %c0_22 = arith.constant 0 : index
    %c0_23 = arith.constant 0 : index
    %c0_24 = arith.constant 0 : index
    %41 = vector.load %arg11[%c0_21, %c0_22, %c0_23, %c0_24] : memref<1x4x32x8xbf16, #tpu.memory_space<vmem>>, vector<1x4x32x8xbf16>
    %42 = vector.shape_cast %41 : vector<1x4x32x8xbf16> to vector<4x32x8xbf16>
    "tpu.trace_start"() <{level = 10 : i32, message = "hsd,hde->hse"}> : () -> ()
    %cst_25 = arith.constant dense<0.000000e+00> : vector<4x8x8xf32>
    %43 = tpu.matmul %33, %42, %cst_25 {dimension_numbers = #tpu.dot_dimension_numbers<[2], [1], [1], [2], [0, 0, 0, 1, 1, 2], [0], [0]>} : vector<4x8x32xbf16>, vector<4x32x8xbf16>, vector<4x8x8xf32> -> vector<4x8x8xf32>
    "tpu.trace_stop"() : () -> ()
    %c0_26 = arith.constant 0 : index
    %c0_27 = arith.constant 0 : index
    %c0_28 = arith.constant 0 : index
    %c0_29 = arith.constant 0 : index
    %44 = vector.load %arg12[%c0_26, %c0_27, %c0_28, %c0_29] : memref<1x4x1x8xf32, #tpu.memory_space<vmem>>, vector<1x4x1x8xf32>
    %45 = vector.shape_cast %44 : vector<1x4x1x8xf32> to vector<4x1x8xf32>
    %46 = vector.broadcast %45 : vector<4x1x8xf32> to vector<4x8x8xf32>
    %47 = arith.addf %43, %46 : vector<4x8x8xf32>
    %c0_30 = arith.constant 0 : index
    %c0_31 = arith.constant 0 : index
    %c0_32 = arith.constant 0 : index
    %c0_33 = arith.constant 0 : index
    %48 = vector.load %arg13[%c0_30, %c0_31, %c0_32, %c0_33] : memref<1x4x32x8xbf16, #tpu.memory_space<vmem>>, vector<1x4x32x8xbf16>
    %49 = vector.shape_cast %48 : vector<1x4x32x8xbf16> to vector<4x32x8xbf16>
    "tpu.trace_start"() <{level = 10 : i32, message = "hsd,hde->hse"}> : () -> ()
    %cst_34 = arith.constant dense<0.000000e+00> : vector<4x8x8xf32>
    %50 = tpu.matmul %33, %49, %cst_34 {dimension_numbers = #tpu.dot_dimension_numbers<[2], [1], [1], [2], [0, 0, 0, 1, 1, 2], [0], [0]>} : vector<4x8x32xbf16>, vector<4x32x8xbf16>, vector<4x8x8xf32> -> vector<4x8x8xf32>
    "tpu.trace_stop"() : () -> ()
    %c0_35 = arith.constant 0 : index
    %c0_36 = arith.constant 0 : index
    %c0_37 = arith.constant 0 : index
    %c0_38 = arith.constant 0 : index
    %51 = vector.load %arg14[%c0_35, %c0_36, %c0_37, %c0_38] : memref<1x4x1x8xf32, #tpu.memory_space<vmem>>, vector<1x4x1x8xf32>
    %52 = vector.shape_cast %51 : vector<1x4x1x8xf32> to vector<4x1x8xf32>
    %53 = vector.broadcast %52 : vector<4x1x8xf32> to vector<4x8x8xf32>
    %54 = arith.addf %50, %53 : vector<4x8x8xf32>
    %55 = arith.truncf %40 : vector<4x8x8xf32> to vector<4x8x8xbf16>
    %56 = arith.truncf %47 : vector<4x8x8xf32> to vector<4x8x8xbf16>
    "tpu.trace_start"() <{level = 10 : i32, message = "hqe,hke->hqk"}> : () -> ()
    %cst_39 = arith.constant dense<0.000000e+00> : vector<4x8x8xf32>
    %57 = tpu.matmul %55, %56, %cst_39 {dimension_numbers = #tpu.dot_dimension_numbers<[2], [2], [1], [1], [0, 0, 0, 1, 1, 1], [0], [0]>} : vector<4x8x8xbf16>, vector<4x8x8xbf16>, vector<4x8x8xf32> -> vector<4x8x8xf32>
    "tpu.trace_stop"() : () -> ()
    %cst_40 = arith.constant 0.353553385 : f32
    %58 = vector.broadcast %cst_40 : f32 to vector<4x8x8xf32>
    %59 = arith.mulf %57, %58 : vector<4x8x8xf32>
    %c0_41 = arith.constant 0 : index
    %c0_42 = arith.constant 0 : index
    %60 = vector.load %arg4[%c0_41, %c0_42] : memref<8x8xf32, #tpu.memory_space<vmem>>, vector<8x8xf32>
    %61 = vector.shape_cast %60 : vector<8x8xf32> to vector<1x8x8xf32>
    %62 = vector.broadcast %61 : vector<1x8x8xf32> to vector<4x8x8xf32>
    %63 = arith.addf %59, %62 : vector<4x8x8xf32>
    %cst_43 = arith.constant dense<0xFF800000> : vector<4x8xf32>
    %64 = vector.multi_reduction <maximumf>, %63, %cst_43 [2] : vector<4x8x8xf32> to vector<4x8xf32>
    %65 = vector.shape_cast %64 : vector<4x8xf32> to vector<4x8x1xf32>
    %66 = vector.broadcast %65 : vector<4x8x1xf32> to vector<4x8x8xf32>
    %67 = arith.subf %63, %66 : vector<4x8x8xf32>
    %68 = math.exp %67 : vector<4x8x8xf32>
    %cst_44 = arith.constant dense<0.000000e+00> : vector<4x8xf32>
    %69 = vector.multi_reduction <add>, %68, %cst_44 [2] : vector<4x8x8xf32> to vector<4x8xf32>
    %70 = vector.shape_cast %69 : vector<4x8xf32> to vector<4x8x1xf32>
    %71 = tpu.reciprocal %70 {approx = true} : vector<4x8x1xf32> -> vector<4x8x1xf32>
    %72 = vector.broadcast %71 : vector<4x8x1xf32> to vector<4x8x8xf32>
    %73 = arith.mulf %68, %72 : vector<4x8x8xf32>
    %74 = arith.truncf %73 : vector<4x8x8xf32> to vector<4x8x8xbf16>
    %75 = arith.truncf %54 : vector<4x8x8xf32> to vector<4x8x8xbf16>
    "tpu.trace_start"() <{level = 10 : i32, message = "hqk,hke->hqe"}> : () -> ()
    %cst_45 = arith.constant dense<0.000000e+00> : vector<4x8x8xf32>
    %76 = tpu.matmul %74, %75, %cst_45 {dimension_numbers = #tpu.dot_dimension_numbers<[2], [1], [1], [2], [0, 0, 0, 1, 1, 2], [0], [0]>} : vector<4x8x8xbf16>, vector<4x8x8xbf16>, vector<4x8x8xf32> -> vector<4x8x8xf32>
    "tpu.trace_stop"() : () -> ()
    %77 = arith.truncf %76 : vector<4x8x8xf32> to vector<4x8x8xbf16>
    %c0_46 = arith.constant 0 : index
    %c0_47 = arith.constant 0 : index
    %c0_48 = arith.constant 0 : index
    %c0_49 = arith.constant 0 : index
    %78 = vector.load %arg15[%c0_46, %c0_47, %c0_48, %c0_49] : memref<1x4x8x32xbf16, #tpu.memory_space<vmem>>, vector<1x4x8x32xbf16>
    %79 = vector.shape_cast %78 : vector<1x4x8x32xbf16> to vector<4x8x32xbf16>
    "tpu.trace_start"() <{level = 10 : i32, message = "hse,hed->hsd"}> : () -> ()
    %cst_50 = arith.constant dense<0.000000e+00> : vector<4x8x32xf32>
    %80 = tpu.matmul %77, %79, %cst_50 {dimension_numbers = #tpu.dot_dimension_numbers<[2], [1], [1], [2], [0, 0, 0, 1, 1, 2], [0], [0]>} : vector<4x8x8xbf16>, vector<4x8x32xbf16>, vector<4x8x32xf32> -> vector<4x8x32xf32>
    "tpu.trace_stop"() : () -> ()
    %cst_51 = arith.constant dense<0.000000e+00> : vector<8x32xf32>
    %81 = vector.multi_reduction <add>, %80, %cst_51 [0] : vector<4x8x32xf32> to vector<8x32xf32>
    %c0_52 = arith.constant 0 : index
    %c0_53 = arith.constant 0 : index
    %c0_54 = arith.constant 0 : index
    %82 = vector.load %arg16[%c0_52, %c0_53, %c0_54] : memref<1x1x32xf32, #tpu.memory_space<vmem>>, vector<1x1x32xf32>
    %83 = vector.shape_cast %82 : vector<1x1x32xf32> to vector<1x32xf32>
    %84 = vector.broadcast %83 : vector<1x32xf32> to vector<8x32xf32>
    %85 = arith.addf %81, %84 : vector<8x32xf32>
    %86 = arith.addf %3, %85 : vector<8x32xf32>
    %c0_55 = arith.constant 0 : index
    %c0_56 = arith.constant 0 : index
    %c0_57 = arith.constant 0 : index
    %87 = vector.load %arg17[%c0_55, %c0_56, %c0_57] : memref<1x1x32xf32, #tpu.memory_space<vmem>>, vector<1x1x32xf32>
    %88 = vector.shape_cast %87 : vector<1x1x32xf32> to vector<1x32xf32>
    %c0_58 = arith.constant 0 : index
    %c0_59 = arith.constant 0 : index
    %c0_60 = arith.constant 0 : index
    %89 = vector.load %arg18[%c0_58, %c0_59, %c0_60] : memref<1x1x32xf32, #tpu.memory_space<vmem>>, vector<1x1x32xf32>
    %90 = vector.shape_cast %89 : vector<1x1x32xf32> to vector<1x32xf32>
    %cst_61 = arith.constant dense<0.000000e+00> : vector<8xf32>
    %91 = vector.multi_reduction <add>, %86, %cst_61 [1] : vector<8x32xf32> to vector<8xf32>
    %92 = vector.shape_cast %91 : vector<8xf32> to vector<8x1xf32>
    %cst_62 = arith.constant 3.200000e+01 : f32
    %93 = vector.broadcast %cst_62 : f32 to vector<8x1xf32>
    %94 = arith.divf %92, %93 : vector<8x1xf32>
    %95 = vector.broadcast %94 : vector<8x1xf32> to vector<8x32xf32>
    %96 = arith.subf %86, %95 : vector<8x32xf32>
    %97 = arith.mulf %96, %96 : vector<8x32xf32>
    %cst_63 = arith.constant dense<0.000000e+00> : vector<8xf32>
    %98 = vector.multi_reduction <add>, %97, %cst_63 [1] : vector<8x32xf32> to vector<8xf32>
    %99 = vector.shape_cast %98 : vector<8xf32> to vector<8x1xf32>
    %cst_64 = arith.constant 3.200000e+01 : f32
    %100 = vector.broadcast %cst_64 : f32 to vector<8x1xf32>
    %101 = arith.divf %99, %100 : vector<8x1xf32>
    %102 = vector.broadcast %94 : vector<8x1xf32> to vector<8x32xf32>
    %103 = arith.subf %86, %102 : vector<8x32xf32>
    %cst_65 = arith.constant 9.99999974E-6 : f32
    %104 = vector.broadcast %cst_65 : f32 to vector<8x1xf32>
    %105 = arith.addf %101, %104 : vector<8x1xf32>
    %106 = math.rsqrt %105 : vector<8x1xf32>
    %107 = vector.broadcast %106 : vector<8x1xf32> to vector<8x32xf32>
    %108 = arith.mulf %103, %107 : vector<8x32xf32>
    %109 = vector.broadcast %88 : vector<1x32xf32> to vector<8x32xf32>
    %110 = arith.mulf %108, %109 : vector<8x32xf32>
    %111 = vector.broadcast %90 : vector<1x32xf32> to vector<8x32xf32>
    %112 = arith.addf %110, %111 : vector<8x32xf32>
    %113 = arith.truncf %112 : vector<8x32xf32> to vector<8x32xbf16>
    %c0_66 = arith.constant 0 : index
    %c0_67 = arith.constant 0 : index
    %c0_68 = arith.constant 0 : index
    %114 = vector.load %arg19[%c0_66, %c0_67, %c0_68] : memref<1x32x64xbf16, #tpu.memory_space<vmem>>, vector<1x32x64xbf16>
    %115 = vector.shape_cast %114 : vector<1x32x64xbf16> to vector<32x64xbf16>
    %cst_69 = arith.constant dense<0.000000e+00> : vector<8x64xf32>
    %116 = tpu.matmul %113, %115, %cst_69 {dimension_numbers = #tpu.dot_dimension_numbers<[1], [0], [0], [1], [0, 0, 1, 1], [], []>} : vector<8x32xbf16>, vector<32x64xbf16>, vector<8x64xf32> -> vector<8x64xf32>
    %c0_70 = arith.constant 0 : index
    %c0_71 = arith.constant 0 : index
    %c0_72 = arith.constant 0 : index
    %117 = vector.load %arg20[%c0_70, %c0_71, %c0_72] : memref<1x1x64xf32, #tpu.memory_space<vmem>>, vector<1x1x64xf32>
    %118 = vector.shape_cast %117 : vector<1x1x64xf32> to vector<1x64xf32>
    %119 = vector.broadcast %118 : vector<1x64xf32> to vector<8x64xf32>
    %120 = arith.addf %116, %119 : vector<8x64xf32>
    %cst_73 = arith.constant 0.000000e+00 : f32
    %121 = vector.broadcast %cst_73 : f32 to vector<8x64xf32>
    %122 = arith.maximumf %120, %121 : vector<8x64xf32>
    %123 = arith.truncf %122 : vector<8x64xf32> to vector<8x64xbf16>
    %c0_74 = arith.constant 0 : index
    %c0_75 = arith.constant 0 : index
    %c0_76 = arith.constant 0 : index
    %124 = vector.load %arg21[%c0_74, %c0_75, %c0_76] : memref<1x64x32xbf16, #tpu.memory_space<vmem>>, vector<1x64x32xbf16>
    %125 = vector.shape_cast %124 : vector<1x64x32xbf16> to vector<64x32xbf16>
    %cst_77 = arith.constant dense<0.000000e+00> : vector<8x32xf32>
    %126 = tpu.matmul %123, %125, %cst_77 {dimension_numbers = #tpu.dot_dimension_numbers<[1], [0], [0], [1], [0, 0, 1, 1], [], []>} : vector<8x64xbf16>, vector<64x32xbf16>, vector<8x32xf32> -> vector<8x32xf32>
    %c0_78 = arith.constant 0 : index
    %c0_79 = arith.constant 0 : index
    %c0_80 = arith.constant 0 : index
    %127 = vector.load %arg22[%c0_78, %c0_79, %c0_80] : memref<1x1x32xf32, #tpu.memory_space<vmem>>, vector<1x1x32xf32>
    %128 = vector.shape_cast %127 : vector<1x1x32xf32> to vector<1x32xf32>
    %129 = vector.broadcast %128 : vector<1x32xf32> to vector<8x32xf32>
    %130 = arith.addf %126, %129 : vector<8x32xf32>
    %131 = arith.addf %86, %130 : vector<8x32xf32>
    %c0_81 = arith.constant 0 : index
    %c0_82 = arith.constant 0 : index
    %132 = vector.load %arg26[%c0_81, %c0_82] : memref<8x32xf32, #tpu.memory_space<vmem>>, vector<8x32xf32>
    tpu.vector_store %arg26[%c0_81, %c0_82], %131 {strides = array<i32>} : memref<8x32xf32, #tpu.memory_space<vmem>>, vector<8x32xf32>,
    %c1_i32 = arith.constant 1 : i32
    %133 = arith.cmpi eq, %arg1, %c1_i32 : i32
    %134 = arith.extui %133 : i1 to i32
    %c0_i32_83 = arith.constant 0 : i32
    %135 = arith.cmpi ne, %134, %c0_i32_83 : i32
    scf.if %135 {
      %136 = vector.extract_strided_slice %131 {offsets = [0, 0], sizes = [4, 32], strides = [1, 1]} : vector<8x32xf32> to vector<4x32xf32>
      %137 = arith.truncf %136 : vector<4x32xf32> to vector<4x32xbf16>
      %c0_84 = arith.constant 0 : index
      %c0_85 = arith.constant 0 : index
      %138 = vector.load %arg23[%c0_84, %c0_85] : memref<32x16xbf16, #tpu.memory_space<vmem>>, vector<32x16xbf16>
      %cst_86 = arith.constant dense<0.000000e+00> : vector<4x16xf32>
      %139 = tpu.matmul %137, %138, %cst_86 {dimension_numbers = #tpu.dot_dimension_numbers<[1], [0], [0], [1], [0, 0, 1, 1], [], []>} : vector<4x32xbf16>, vector<32x16xbf16>, vector<4x16xf32> -> vector<4x16xf32>
      %c0_87 = arith.constant 0 : index
      %c0_88 = arith.constant 0 : index
      %140 = vector.load %arg24[%c0_87, %c0_88] : memref<1x16xf32, #tpu.memory_space<vmem>>, vector<1x16xf32>
      %141 = vector.broadcast %140 : vector<1x16xf32> to vector<4x16xf32>
      %142 = arith.addf %139, %141 : vector<4x16xf32>
      %c0_89 = arith.constant 0 : index
      %c0_90 = arith.constant 0 : index
      %c0_91 = arith.constant 0 : index
      %143 = vector.load %arg25[%c0_89, %c0_90, %c0_91] : memref<1x4x16xf32, #tpu.memory_space<vmem>>, vector<1x4x16xf32>
      %144 = vector.shape_cast %143 : vector<1x4x16xf32> to vector<4x16xf32>
      %145 = vector.shape_cast %142 : vector<4x16xf32> to vector<1x4x16xf32>
      tpu.vector_store %arg25[%c0_89, %c0_90, %c0_91], %145 {strides = array<i32>} : memref<1x4x16xf32, #tpu.memory_space<vmem>>, vector<1x4x16xf32>,
    } else {
    }
    return
  }
  func.func @transform_0(%arg0: i32, %arg1: i32) -> (i32, i32, i32) {
    %c0_i32 = arith.constant 0 : i32
    %c0_i32_0 = arith.constant 0 : i32
    %c0_i32_1 = arith.constant 0 : i32
    return %arg0, %c0_i32, %c0_i32_0 : i32, i32, i32
  }
  func.func @transform_1(%arg0: i32, %arg1: i32) -> (i32, i32) {
    %c0_i32 = arith.constant 0 : i32
    %c0_i32_0 = arith.constant 0 : i32
    %c0_i32_1 = arith.constant 0 : i32
    return %c0_i32, %c0_i32_0 : i32, i32
  }
  func.func @transform_2(%arg0: i32, %arg1: i32) -> (i32, i32) {
    %c0_i32 = arith.constant 0 : i32
    %c0_i32_0 = arith.constant 0 : i32
    %c0_i32_1 = arith.constant 0 : i32
    return %c0_i32, %c0_i32_0 : i32, i32
  }
  func.func @transform_3(%arg0: i32, %arg1: i32) -> (i32, i32) {
    %c0_i32 = arith.constant 0 : i32
    %c0_i32_0 = arith.constant 0 : i32
    %c0_i32_1 = arith.constant 0 : i32
    return %c0_i32, %c0_i32_0 : i32, i32
  }
  func.func @transform_4(%arg0: i32, %arg1: i32) -> (i32, i32) {
    %c0_i32 = arith.constant 0 : i32
    %c0_i32_0 = arith.constant 0 : i32
    %c0_i32_1 = arith.constant 0 : i32
    return %c0_i32, %c0_i32_0 : i32, i32
  }
  func.func @transform_5(%arg0: i32, %arg1: i32) -> (i32, i32, i32) {
    %c0_i32 = arith.constant 0 : i32
    %c0_i32_0 = arith.constant 0 : i32
    %c0_i32_1 = arith.constant 0 : i32
    return %arg1, %c0_i32, %c0_i32_0 : i32, i32, i32
  }
  func.func @transform_6(%arg0: i32, %arg1: i32) -> (i32, i32, i32) {
    %c0_i32 = arith.constant 0 : i32
    %c0_i32_0 = arith.constant 0 : i32
    %c0_i32_1 = arith.constant 0 : i32
    return %arg1, %c0_i32, %c0_i32_0 : i32, i32, i32
  }
  func.func @transform_7(%arg0: i32, %arg1: i32) -> (i32, i32, i32, i32) {
    %c0_i32 = arith.constant 0 : i32
    %c0_i32_0 = arith.constant 0 : i32
    %c0_i32_1 = arith.constant 0 : i32
    %c0_i32_2 = arith.constant 0 : i32
    return %arg1, %c0_i32, %c0_i32_0, %c0_i32_1 : i32, i32, i32, i32
  }
  func.func @transform_8(%arg0: i32, %arg1: i32) -> (i32, i32, i32, i32) {
    %c0_i32 = arith.constant 0 : i32
    %c0_i32_0 = arith.constant 0 : i32
    %c0_i32_1 = arith.constant 0 : i32
    %c0_i32_2 = arith.constant 0 : i32
    return %arg1, %c0_i32, %c0_i32_0, %c0_i32_1 : i32, i32, i32, i32
  }
  func.func @transform_9(%arg0: i32, %arg1: i32) -> (i32, i32, i32, i32) {
    %c0_i32 = arith.constant 0 : i32
    %c0_i32_0 = arith.constant 0 : i32
    %c0_i32_1 = arith.constant 0 : i32
    %c0_i32_2 = arith.constant 0 : i32
    return %arg1, %c0_i32, %c0_i32_0, %c0_i32_1 : i32, i32, i32, i32
  }
  func.func @transform_10(%arg0: i32, %arg1: i32) -> (i32, i32, i32, i32) {
    %c0_i32 = arith.constant 0 : i32
    %c0_i32_0 = arith.constant 0 : i32
    %c0_i32_1 = arith.constant 0 : i32
    %c0_i32_2 = arith.constant 0 : i32
    return %arg1, %c0_i32, %c0_i32_0, %c0_i32_1 : i32, i32, i32, i32
  }
  func.func @transform_11(%arg0: i32, %arg1: i32) -> (i32, i32, i32, i32) {
    %c0_i32 = arith.constant 0 : i32
    %c0_i32_0 = arith.constant 0 : i32
    %c0_i32_1 = arith.constant 0 : i32
    %c0_i32_2 = arith.constant 0 : i32
    return %arg1, %c0_i32, %c0_i32_0, %c0_i32_1 : i32, i32, i32, i32
  }
  func.func @transform_12(%arg0: i32, %arg1: i32) -> (i32, i32, i32, i32) {
    %c0_i32 = arith.constant 0 : i32
    %c0_i32_0 = arith.constant 0 : i32
    %c0_i32_1 = arith.constant 0 : i32
    %c0_i32_2 = arith.constant 0 : i32
    return %arg1, %c0_i32, %c0_i32_0, %c0_i32_1 : i32, i32, i32, i32
  }
  func.func @transform_13(%arg0: i32, %arg1: i32) -> (i32, i32, i32, i32) {
    %c0_i32 = arith.constant 0 : i32
    %c0_i32_0 = arith.constant 0 : i32
    %c0_i32_1 = arith.constant 0 : i32
    %c0_i32_2 = arith.constant 0 : i32
    return %arg1, %c0_i32, %c0_i32_0, %c0_i32_1 : i32, i32, i32, i32
  }
  func.func @transform_14(%arg0: i32, %arg1: i32) -> (i32, i32, i32) {
    %c0_i32 = arith.constant 0 : i32
    %c0_i32_0 = arith.constant 0 : i32
    %c0_i32_1 = arith.constant 0 : i32
    return %arg1, %c0_i32, %c0_i32_0 : i32, i32, i32
  }
  func.func @transform_15(%arg0: i32, %arg1: i32) -> (i32, i32, i32) {
    %c0_i32 = arith.constant 0 : i32
    %c0_i32_0 = arith.constant 0 : i32
    %c0_i32_1 = arith.constant 0 : i32
    return %arg1, %c0_i32, %c0_i32_0 : i32, i32, i32
  }
  func.func @transform_16(%arg0: i32, %arg1: i32) -> (i32, i32, i32) {
    %c0_i32 = arith.constant 0 : i32
    %c0_i32_0 = arith.constant 0 : i32
    %c0_i32_1 = arith.constant 0 : i32
    return %arg1, %c0_i32, %c0_i32_0 : i32, i32, i32
  }
  func.func @transform_17(%arg0: i32, %arg1: i32) -> (i32, i32, i32) {
    %c0_i32 = arith.constant 0 : i32
    %c0_i32_0 = arith.constant 0 : i32
    %c0_i32_1 = arith.constant 0 : i32
    return %arg1, %c0_i32, %c0_i32_0 : i32, i32, i32
  }
  func.func @transform_18(%arg0: i32, %arg1: i32) -> (i32, i32, i32) {
    %c0_i32 = arith.constant 0 : i32
    %c0_i32_0 = arith.constant 0 : i32
    %c0_i32_1 = arith.constant 0 : i32
    return %arg1, %c0_i32, %c0_i32_0 : i32, i32, i32
  }
  func.func @transform_19(%arg0: i32, %arg1: i32) -> (i32, i32, i32) {
    %c0_i32 = arith.constant 0 : i32
    %c0_i32_0 = arith.constant 0 : i32
    %c0_i32_1 = arith.constant 0 : i32
    return %arg1, %c0_i32, %c0_i32_0 : i32, i32, i32
  }
  func.func @transform_20(%arg0: i32, %arg1: i32) -> (i32, i32, i32) {
    %c0_i32 = arith.constant 0 : i32
    %c0_i32_0 = arith.constant 0 : i32
    %c0_i32_1 = arith.constant 0 : i32
    return %arg1, %c0_i32, %c0_i32_0 : i32, i32, i32
  }
  func.func @transform_21(%arg0: i32, %arg1: i32) -> (i32, i32) {
    %c0_i32 = arith.constant 0 : i32
    %c0_i32_0 = arith.constant 0 : i32
    %c0_i32_1 = arith.constant 0 : i32
    return %c0_i32, %c0_i32_0 : i32, i32
  }
  func.func @transform_22(%arg0: i32, %arg1: i32) -> (i32, i32) {
    %c0_i32 = arith.constant 0 : i32
    %c0_i32_0 = arith.constant 0 : i32
    %c0_i32_1 = arith.constant 0 : i32
    return %c0_i32, %c0_i32_0 : i32, i32
  }
  func.func @transform_23(%arg0: i32, %arg1: i32) -> (i32, i32, i32) {
    %c0_i32 = arith.constant 0 : i32
    %c0_i32_0 = arith.constant 0 : i32
    %c0_i32_1 = arith.constant 0 : i32
    return %arg0, %c0_i32, %c0_i32_0 : i32, i32, i32
  }
}

</mosaic_0001>

<bundles_post_ra>
// kernel: tpu_custom_call.1
= control target key start
LH: loop header
LB: loop body
LE: loop exit
PB: predicated region body
PF: predicated region fallthrough
CT: control target
= control target key end

     0   :  { %s3168_s0 = inlined_call_operand.vmem [shape: f32[2,8,32], index: 0, kind: input, shape index: {}]   ;;  %s3169_s1 = inlined_call_operand.vmem [shape: f32[8,32], index: 1, kind: input, shape index: {}]   ;;  %s3170_s2 = inlined_call_operand.vmem [shape: f32[8,8], index: 2, kind: input, shape index: {}]   ;;  %s3171_s3 = inlined_call_operand.vmem [shape: bf16[32,32], index: 3, kind: input, shape index: {}]   ;;  %s3172_s4 = inlined_call_operand.vmem [shape: f32[1,32], index: 4, kind: input, shape index: {}]   ;;  %s3173_s5 = inlined_call_operand.vmem [shape: f32[2,1,32], index: 5, kind: input, shape index: {}]   ;;  %s3174_s6 = inlined_call_operand.vmem [shape: f32[2,1,32], index: 6, kind: input, shape index: {}]   ;;  %s3175_s7 = inlined_call_operand.vmem [shape: bf16[2,4,32,8], index: 7, kind: input, shape index: {}]   ;;  %s3176_s8 = inlined_call_operand.vmem [shape: f32[2,4,1,8], index: 8, kind: input, shape index: {}]   ;;  %s3177_s9 = inlined_call_operand.vmem [shape: bf16[2,4,32,8], index: 9, kind: input, shape index: {}]   ;;  %s3178_s10 = inlined_call_operand.vmem [shape: f32[2,4,1,8], index: 10, kind: input, shape index: {}]   ;;  %s3179_s11 = inlined_call_operand.vmem [shape: bf16[2,4,32,8], index: 11, kind: input, shape index: {}]   ;;  %s3180_s12 = inlined_call_operand.vmem [shape: f32[2,4,1,8], index: 12, kind: input, shape index: {}]   ;;  %s3181_s13 = inlined_call_operand.vmem [shape: bf16[2,4,8,32], index: 13, kind: input, shape index: {}]   ;;  %s3182_s14 = inlined_call_operand.vmem [shape: f32[2,1,32], index: 14, kind: input, shape index: {}]   ;;  %s3183_s15 = inlined_call_operand.vmem [shape: f32[2,1,32], index: 15, kind: input, shape index: {}]   ;;  %s3184_s16 = inlined_call_operand.vmem [shape: f32[2,1,32], index: 16, kind: input, shape index: {}]   ;;  %s3185_s17 = inlined_call_operand.vmem [shape: bf16[2,32,64], index: 17, kind: input, shape index: {}]   ;;  %s3186_s18 = inlined_call_operand.vmem [shape: f32[2,1,64], index: 18, kind: input, shape index: {}]   ;;  %s3187_s19 = inlined_call_operand.vmem [shape: bf16[2,64,32], index: 19, kind: input, shape index: {}]   ;;  %s3188_s20 = inlined_call_operand.vmem [shape: f32[2,1,32], index: 20, kind: input, shape index: {}]   ;;  %s3189_s21 = inlined_call_operand.vmem [shape: bf16[32,16], index: 21, kind: input, shape index: {}]   ;;  %s3190_s22 = inlined_call_operand.vmem [shape: f32[1,16], index: 22, kind: input, shape index: {}]   ;;  %s3191_s23 = inlined_call_operand.hbm [shape: f32[2,4,16], index: 23, kind: output, shape index: {}]  }
   0x1   :  { %3210 = sst [smem:[#allocation20_spill]] %s3168_s0 }
   0x2   :  { %3211 = sst [smem:[#allocation21_spill]] %s3169_s1 }
   0x3   :  { %3212 = sst [smem:[#allocation22_spill]] %s3170_s2 }
   0x4   :  { %3213 = sst [smem:[#allocation23_spill]] %s3171_s3 }
   0x5   :  { %3214 = sst [smem:[#allocation24_spill]] %s3172_s4 }
   0x6   :  { %3215 = sst [smem:[#allocation25_spill]] %s3173_s5 }
   0x7   :  { %3216 = sst [smem:[#allocation26_spill]] %s3174_s6 }
   0x8   :  { %3217 = sst [smem:[#allocation27_spill]] %s3175_s7 }
   0x9   :  { %3218 = sst [smem:[#allocation28_spill]] %s3176_s8 }
   0xa   :  { %3219 = sst [smem:[#allocation29_spill]] %s3177_s9 }
   0xb   :  { %3220 = sst [smem:[#allocation30_spill]] %s3178_s10 }
   0xc   :  { %3221 = sst [smem:[#allocation31_spill]] %s3179_s11 }
   0xd   :  { %3222 = sst [smem:[#allocation32_spill]] %s3180_s12 }
   0xe   :  { %3223 = sst [smem:[#allocation33_spill]] %s3181_s13 }
   0xf   :  { %3224 = sst [smem:[#allocation34_spill]] %s3182_s14 }
  0x10   :  { %3225 = sst [smem:[#allocation35_spill]] %s3183_s15 }
  0x11   :  { %3226 = sst [smem:[#allocation36_spill]] %s3187_s19 }
  0x12   :  { %3227 = sst [smem:[#allocation37_spill]] %s3188_s20 }
  0x13   :  { %3228 = sst [smem:[#allocation38_spill]] %s3189_s21 }
  0x14   :  { %3229 = sst [smem:[#allocation39_spill]] %s3190_s22 }
  0x15   :  { %3230 = sst [smem:[#allocation40_spill]] %s3191_s23 }
  0x16   :  { %28 = vsyncpa [#allocation4], 0 }
  0x17   :  { %30 = vsyncpa [#allocation4 + $0x1], 0  ;;  %s2786_s4 = smov 0   ;;  %s2788_s30 = smov 0  }
  0x18   :  { %s2790_s24 = smov 0   ;;  %s2792_s25 = smov 0  }
  0x19   :  { %s2794_s5 = smov 0   ;;  %s2796_s1 = smov 0  }
  0x1a   :  { %s2798_s26 = smov 0   ;;  %s2800_s2 = smov 0  }
  0x1b LB: > { %3231 = sst [smem:[#allocation6_spill]] %s2635_s4  ;;  %s2222_s6 = sadd.s32 4294967295, %s2663_s2   ;;  %s2663_s2 = sphi %s2800_s2, %s36_s2   ;;  %s2659_s26 = sphi %s2798_s26, %s3293_s26   ;;  %s2655_s1 = sphi %s2796_s1, %s3292_s1   ;;  %s2651_s5 = sphi %s2794_s5, %s3291_s5   ;;  %s2647_s25 = sphi %s2792_s25, %s3290_s25   ;;  %s2643_s24 = sphi %s2790_s24, %s3289_s24   ;;  %s2639_s30 = sphi %s2788_s30, %s3288_s30   ;;  %s2635_s4 = sphi %s2786_s4, %s3287_s4  }
  0x1c   : > { %3232 = sst [smem:[#allocation7_spill]] %s2639_s30  ;;  %s2223_s27 = sadd.s32 4294967294, %s2663_s2  }
  0x1d   : > { %3233 = sst [smem:[#allocation8_spill]] %s2643_s24  ;;  %s45_s7 = sadd.s32 1, %s2655_s1 }
  0x1e   : > { %3234 = sst [smem:[#allocation9_spill]] %s2647_s25  ;;  %p46_p0 = scmp.ge.s32.totalorder %s45_s7, 2 }
  0x1f   : > { %3235 = sst [smem:[#allocation10_spill]] %s2651_s5  ;;  %s48_s28 = sadd.s32 1, %s2659_s26 }
  0x20   : > { %3236 = sst [smem:[#allocation11_spill]] %s2655_s1  ;;  %p633_p1 = scmp.ne.s32.totalorder %s2643_s24, %s2639_s30 }
  0x21   : > { %3237 = sst [smem:[#allocation12_spill]] %s2659_s26  ;;  %p634_p2 = scmp.eq.s32.totalorder %s2222_s6, 3 }
  0x22   : > { %3238 = sst [smem:[#allocation13_spill]] %s2663_s2  ;;  %s3295_s7 = smov (%p46_p0, %s45_s7), 0 }
  0x23   : > { %3239 = sst [smem:[#allocation14_spill]] %s3295_s7  ;;  %s3297_s28 = smov (!%p46_p0, %s48_s28), %s2659_s26 }
  0x24   : > { %p2835_p3 = por %p634_p2, %p633_p1  ;;  %p639_p4 = scmp.ne.s32.totalorder %s2639_s30, %s2635_s4 }
  0x25   : > { %p50_p5 = scmp.ge.s32.totalorder %s3297_s28, 2  ;;  %p640_p6 = scmp.eq.s32.totalorder %s2223_s27, 3 }
  0x26   : > { %s3240_s29 = scalar_select %p2835_p3, 1, 0 }
  0x27   : > { %p2226_p7 = scmp.ge.s32.totalorder %s2663_s2, 1  ;;  %p794_p8 = scmp.lt.s32.totalorder %s2663_s2, 5 }
  0x28   : > { %3241 = sst [smem:[#allocation15_spill]] %s3240_s29  ;;  %s3299_s28 = smov (%p50_p5, %s3297_s28), 0 }
  0x29   : > { %3242 = sst [smem:[#allocation16_spill]] %s3299_s28  ;;  %p2845_p9 = por %p640_p6, %p639_p4 }
  0x2a   : > { %p795_p10 = pnand %p2226_p7, %p794_p8  ;;  %s620_s0 = ssub.s32 %s2659_s26, %s3299_s28 }
  0x2b   : > { %s3243_s3 = scalar_select %p2845_p9, 1, 0 }
  0x2c   : > { %s623_s6 = sadd.s32 1, %s2643_s24  ;;  %p621_p11 = scmp.eq.s32.totalorder %s620_s0, 0 }
  0x2d   : > { %3244 = sst [smem:[#allocation17_spill]] %s3243_s3  ;;  %798 = sbr.rel (%p795_p10) target bundleno = 2029 (0x7ed), region = 112 }
  0x2e   : > { %s2853_s7 = scalar_select %p621_p11, %s2643_s24, %s623_s6  }
  0x30   : > { %3245 = sst [smem:[#allocation18_spill]] %s2853_s7 }
  0x32   : > { %s3199_s27 = sand.u32 1, %s2639_s30   ;;  %p920_p12 = scmp.lt.s32.totalorder %s2651_s5, 1 }
  0x33   : > { %s2859_s1 = sshll.u32 %s3199_s27, 2  ;;  %p924_p13 = scmp.lt.s32.totalorder %s2647_s25, 1 }
  0x34   : > { %s921_s3 = scalar_select %p920_p12, %s2651_s5, 1 }
  0x35   : > { %s2864_s4 = scalar_select %p924_p13, %s2647_s25, 1 }
  0x36   : > { %s2228_s0 = sshll.u32 %s921_s3, 3  ;;  %s3246_s26 = sld [smem:[#allocation20_spill]] }
  0x37   : > { %s2414_s21 = sshll.u32 %s2864_s4, 6  ;;  %s3249_s20 = sld [smem:[#allocation27_spill]] }
  0x38   : > { %s2231_s28 = sshll.u32 %s2864_s4, 2  ;;  %s3250_s8 = sld [smem:[#allocation28_spill]] }
  0x39   : > { %s3252_s9 = sld [smem:[#allocation29_spill]]  ;;  %s2417_s23 = sshll.u32 %s2864_s4, 4 }
  0x3a   : > { %s3253_s10 = sld [smem:[#allocation30_spill]]  ;;  %s970_s22 = scalar_lea.vmem %s3184_s16, %s2864_s4 }
  0x3b   : > { %s3254_s11 = sld [smem:[#allocation31_spill]]  ;;  %s919_s19 = scalar_lea.vmem [#allocation3], %s2859_s1 }
  0x3c   : > { %s923_s7 = scalar_lea.vmem %s3246_s26, %s2228_s0  ;;  %s3255_s12 = sld [smem:[#allocation32_spill]] }
  0x3d   : > { %s2881_s3 = scalar_lea.vmem %s3249_s20, %s2414_s21  ;;  %s3256_s13 = sld [smem:[#allocation33_spill]] }
  0x3e   : > { %s2887_s24 = scalar_lea.vmem %s3250_s8, %s2231_s28  ;;  %s3259_s29 = sld [smem:[#allocation37_spill]] }
  0x3f   : > { %3251 = sst [smem:[#allocation19_spill]] %s2887_s24  ;;  %s2892_s30 = scalar_lea.vmem %s3252_s9, %s2414_s21 }
  0x40   : > { %s2897_s0 = scalar_lea.vmem %s3253_s10, %s2231_s28  ;;  %s3261_s20 = sld [smem:[#allocation9_spill]] }
  0x41   : > { %s2902_s25 = scalar_lea.vmem %s3254_s11, %s2414_s21  ;;  %s2930_s11 = scalar_lea.vmem %s3185_s17, %s2417_s23 }
  0x42   : > { %s2907_s26 = scalar_lea.vmem %s3255_s12, %s2231_s28  ;;  %s978_s12 = scalar_lea.vmem %s3186_s18, %s2864_s4 }
  0x43   : > { %s2913_s27 = scalar_lea.vmem %s3256_s13, %s2417_s23  ;;  %s2419_s13 = sshll.u32 %s2864_s4, 5 }
  0x44   : > { %s986_s14 = scalar_lea.vmem %s3259_s29, %s2864_s4  ;;  %s3260_s21 = sld [smem:[#allocation36_spill]] }
  0x46   : > { %p2244_p0 = scmp.ne.s32.totalorder %s3261_s20, 0 }
  0x47   : > { %s3262_s6 = sld [smem:[#allocation23_spill]] (!%p2244_p0) }
  0x48   : > { %991 = sbr.rel (%p2244_p0) target bundleno = 219 (0xdb), region = 116  ;;  %s3264_s10 = sld [smem:[#allocation21_spill]] (!%p2244_p0) }
  0x4a   : > { %s2944_s15 = scalar_lea.vmem %s3260_s21, %s2419_s13  ;;  %s3263_s21 = sld [smem:[#allocation24_spill]] (!%p2244_p0) }
  0x4d   : > { %v2421_v0 = vld [vmem:[%s3262_s6 + $0x8] sm:$0xff]  ;;  %v2420_v1 = vld [vmem:[%s3262_s6] sm:$0xff]  ;;  %vm1014_vm0 = vcmask 261120  }
  0x4e   : > { %1024 = vmatpush.bf16.msra.mxu0 %v2421_v0  ;;  %v992_v2 = vld [vmem:[%s923_s7] sm:$0xff] }
  0x4f   : > { %v993_v3 = vpack.c.bf16 %v992_v2, %v992_v2  ;;  %v1032_v7 = vld [vmem:[%s3264_s10] sm:$0xff] }
  0x50   : > { %v2526_v4 = vld [vmem:[%s3263_s21] ss:$0 sm:$0xff] }
  0x52   : > { %1025 = vmatpush.bf16.msra.mxu0 %v2420_v1 }
  0x55   : > { %2253 = vmatmul.msk.bf16.vlgmr.msra.gmra.mxu0 %vm1014_vm0, %v993_v3 }
  0xd2   : > { %v1027_v5 = vpop.f32.mrf.mxu0 }
  0xd3   : > { %v1028_v6 = vadd.f32 %v2526_v4, %v1027_v5 }
  0xd5   : > { %v1031_v8 = vmul.f32 5.656854, %v1028_v6 }
  0xd7   : > { %v1033_v9 = vadd.f32 %v1032_v7, %v1031_v8 }
  0xd9   : > { %1034 = vst.msk [vmem:[#allocation2] sm:$0xff] %vm1014_vm0, %v1033_v9 }
  0xda   : > { %v1029_v10 = vpop.f32.mrf.mxu0 }
  0xdb PF: > { %vm1038_vm1 = vcmask 261120   ;;  %v2665_v13 = vmov 32.0   ;;  %v2423_v25 = vld [vmem:[%s2881_s3 + $0x8] sm:$0xff]  ;;  %v2425_v26 = vld [vmem:[%s2881_s3 + $0x18] sm:$0xff]  ;;  %v2422_v29 = vld [vmem:[%s2881_s3] sm:$0xff]  ;;  %s3267_s28 = sld [smem:[#allocation26_spill]] }
  0xdc   : > { %2546 = vrcp.f32 %v2665_v13  ;;  %v2427_v27 = vld [vmem:[%s2881_s3 + $0x28] sm:$0xff]  ;;  %v2429_v28 = vld [vmem:[%s2881_s3 + $0x38] sm:$0xff]  ;;  %1130 = vmatpush.bf16.msra.mxu0 %v2423_v25  ;;  %1155 = vmatpush.bf16.msra.mxu1 %v2425_v26  ;;  %v2424_v30 = vld [vmem:[%s2881_s3 + $0x10] sm:$0xff]  ;;  %vm1484_vm6 = vcmask 64512   ;;  %vm1625_vm7 = vcmask 1043456   ;;  %s3270_s2 = sld [smem:[#allocation22_spill]] }
  0xdd   : > { %1180 = vmatpush.bf16.msra.mxu2 %v2427_v27  ;;  %1205 = vmatpush.bf16.msra.mxu3 %v2429_v28  ;;  %v2426_v31 = vld [vmem:[%s2881_s3 + $0x20] sm:$0xff]  ;;  %v2428_v32 = vld [vmem:[%s2881_s3 + $0x30] sm:$0xff]  ;;  %v2431_v34 = vld [vmem:[%s2892_s30 + $0x8] sm:$0xff]  ;;  %s3271_s29 = sld [smem:[#allocation34_spill]]  ;;  %vm1903_vm11 = vcmask 523264  }
  0xde   : > { %v2433_v35 = vld [vmem:[%s2892_s30 + $0x18] sm:$0xff]  ;;  %v2435_v36 = vld [vmem:[%s2892_s30 + $0x28] sm:$0xff]  ;;  %v2430_v39 = vld [vmem:[%s2892_s30] sm:$0xff]  ;;  %s3273_s5 = sld [smem:[#allocation35_spill]] }
  0xdf   : > { %v2437_v38 = vld [vmem:[%s2892_s30 + $0x38] sm:$0xff]  ;;  %v2432_v40 = vld [vmem:[%s2892_s30 + $0x10] sm:$0xff]  ;;  %v2434_v42 = vld [vmem:[%s2892_s30 + $0x20] sm:$0xff] }
  0xe0   : > { %v2960_v11 = vld [vmem:[#allocation2] sm:$0xff]  ;;  %1131 = vmatpush.bf16.msra.mxu0 %v2422_v29  ;;  %1156 = vmatpush.bf16.msra.mxu1 %v2424_v30  ;;  %v2436_v43 = vld [vmem:[%s2892_s30 + $0x30] sm:$0xff]  ;;  %s3265_s30 = sld [smem:[#allocation25_spill]]  ;;  %v2439_v57 = vld [vmem:[%s2902_s25 + $0x8] sm:$0xff] }
  0xe1   : > { %v1039_v12 = vsel %vm1038_vm1, %v2960_v11, 0.0  ;;  %1181 = vmatpush.bf16.msra.mxu2 %v2426_v31  ;;  %1206 = vmatpush.bf16.msra.mxu3 %v2428_v32  ;;  %s3268_s8 = scalar_lea.vmem %s3267_s28, %s2864_s4  ;;  %v2441_v58 = vld [vmem:[%s2902_s25 + $0x18] sm:$0xff]  ;;  %v2443_v59 = vld [vmem:[%s2902_s25 + $0x28] sm:$0xff]  ;;  %v2438_v61 = vld [vmem:[%s2902_s25] sm:$0xff] }
  0xe2   : > { %1040 = vadd.xlane.f32.xlu0 %v1039_v12  ;;  %v2547_v14 = vpop.eup %2546  ;;  %v2528_v52 = vld [vmem:[%s3268_s8] ss:$0 sm:$0xff]  ;;  %v2445_v60 = vld [vmem:[%s2902_s25 + $0x38] sm:$0xff]  ;;  %v2440_v62 = vld [vmem:[%s2902_s25 + $0x10] sm:$0xff] }
  0xe3   : > { %v1043_v15 = vmul.f32 32.0, %v2547_v14  ;;  %vm1047_vm2 = vweird.f32 %v2547_v14  ;;  %v2442_v63 = vld [vmem:[%s2902_s25 + $0x20] sm:$0xff]  ;;  %v2444_v0 = vld [vmem:[%s2902_s25 + $0x30] sm:$0xff]  ;;  %s3269_s25 = sld [smem:[#allocation19_spill]]  ;;  %s3272_s21 = scalar_lea.vmem %s3271_s29, %s2864_s4 }
  0xe4   : > { %1262 = vmatpush.bf16.msrb.mxu0 %v2431_v34  ;;  %1287 = vmatpush.bf16.msrb.mxu1 %v2433_v35  ;;  %v2533_v7 = vld [vmem:[%s2897_s0] ss:$0 sm:$0xff]  ;;  %v2534_v8 = vld [vmem:[%s2897_s0 + $0x1] ss:$0 sm:$0xff]  ;;  %s3274_s10 = scalar_lea.vmem %s3273_s5, %s2864_s4 }
  0xe5   : > { %v1044_v16 = vsub.f32 1.0, %v1043_v15  ;;  %1312 = vmatpush.bf16.msrb.mxu2 %v2435_v36  ;;  %1337 = vmatpush.bf16.msrb.mxu3 %v2437_v38 }
  0xe6   : > { %s3266_s24 = scalar_lea.vmem %s3265_s30, %s2864_s4 }
  0xe7   : > { %v1045_v17 = vmul.f32 %v2547_v14, %v1044_v16  ;;  %v2527_v50 = vld [vmem:[%s3266_s24] ss:$0 sm:$0xff] }
  0xe8   : > { %1263 = vmatpush.bf16.msrb.mxu0 %v2430_v39  ;;  %1288 = vmatpush.bf16.msrb.mxu1 %v2432_v40 }
  0xe9   : > { %v1046_v18 = vadd.f32 %v2547_v14, %v1045_v17  ;;  %1313 = vmatpush.bf16.msrb.mxu2 %v2434_v42  ;;  %1338 = vmatpush.bf16.msrb.mxu3 %v2436_v43  ;;  %v2529_v16 = vld [vmem:[%s3269_s25] ss:$0 sm:$0xff]  ;;  %v2532_v34 = vld [vmem:[%s3269_s25 + $0x3] ss:$0 sm:$0xff]  ;;  %v2538_v42 = vld [vmem:[%s2907_s26 + $0x1] ss:$0 sm:$0xff] }
  0xeb   : > { %v2964_v19 = vsel %vm1047_vm2, %v2547_v14, %v1046_v18 }
 0x155   : > { %v1041_v20 = vpop.xlane.xlu0 %1040 }
 0x156   : > { %v1049_v21 = vmul.f32 %v2964_v19, %v1041_v20  ;;  %v2530_v20 = vld [vmem:[%s3269_s25 + $0x1] ss:$0 sm:$0xff] }
 0x158   : > { %v1050_v22 = vsub.f32 %v2960_v11, %v1049_v21  ;;  %v2535_v21 = vld [vmem:[%s2897_s0 + $0x2] ss:$0 sm:$0xff] }
 0x15a   : > { %v1051_v23 = vmul.f32 %v1050_v22, %v1050_v22 }
 0x15c   : > { %v1052_v24 = vsel %vm1038_vm1, %v1051_v23, 0.0 }
 0x15d   : > { %1053 = vadd.xlane.f32.xlu0 %v1052_v24 }
 0x1d0   : > { %v1054_v33 = vpop.xlane.xlu0 %1053 }
 0x1d1   : > { %v1055_v37 = vmul.f32 %v1054_v33, %v2964_v19  ;;  %v2531_v33 = vld [vmem:[%s3269_s25 + $0x2] ss:$0 sm:$0xff] }
 0x1d3   : > { %v1056_v41 = vadd.f32 1e-05, %v1055_v37 }
 0x1d5   : > { %2548 = vrsqrt.f32 %v1056_v41  ;;  %vm1063_vm4 = vweird.f32 %v1056_v41 }
 0x1db   : > { %v2549_v44 = vpop.eup %2548 }
 0x1dc   : > { %v1058_v45 = vmul.f32 %v2549_v44, %v1056_v41  ;;  %vm1064_vm3 = vweird.f32 %v2549_v44  ;;  %v2537_v41 = vld [vmem:[%s2907_s26] ss:$0 sm:$0xff] }
 0x1dd   : > { %vm1065_vm5 = vmor %vm1063_vm4, %vm1064_vm3 }
 0x1de   : > { %v1059_v46 = vmul.f32 %v2549_v44, %v1058_v45 }
 0x1e0   : > { %v1060_v47 = vmul.f32 0.5, %v1059_v46 }
 0x1e2   : > { %v1061_v48 = vsub.f32 1.5, %v1060_v47 }
 0x1e4   : > { %v1062_v49 = vmul.f32 %v2549_v44, %v1061_v48 }
 0x1e6   : > { %v1066_v51 = vsel %vm1065_vm5, %v2549_v44, %v1062_v49 }
 0x1e7   : > { %v1067_v53 = vmul.f32 %v1066_v51, %v1050_v22  ;;  %v2536_v22 = vld [vmem:[%s2897_s0 + $0x3] ss:$0 sm:$0xff] }
 0x1e9   : > { %v1071_v54 = vmul.f32 %v2527_v50, %v1067_v53 }
 0x1eb   : > { %v1075_v55 = vadd.f32 %v2528_v52, %v1071_v54 }
 0x1ed   : > { %v1076_v56 = vpack.c.bf16 %v1075_v55, %v1075_v55  ;;  %v2539_v55 = vld [vmem:[%s2907_s26 + $0x2] ss:$0 sm:$0xff] }
 0x1ef   : > { %2262 = vmatmul.msk.bf16.vlgmr.msra.gmra.mxu0 %vm1038_vm1, %v1076_v56  ;;  %2271 = vmatmul.msk.bf16.vlgmr.msra.gmra.mxu1 %vm1038_vm1, %v1076_v56 }
 0x1f0   : > { %2280 = vmatmul.msk.bf16.vlgmr.msra.gmra.mxu2 %vm1038_vm1, %v1076_v56  ;;  %2289 = vmatmul.msk.bf16.vlgmr.msra.gmra.mxu3 %vm1038_vm1, %v1076_v56 }
 0x1f1   : > { %1394 = vmatpush.bf16.msra.mxu0 %v2439_v57  ;;  %1419 = vmatpush.bf16.msra.mxu1 %v2441_v58 }
 0x1f2   : > { %1444 = vmatpush.bf16.msra.mxu2 %v2443_v59  ;;  %1469 = vmatpush.bf16.msra.mxu3 %v2445_v60 }
 0x1f5   : > { %1395 = vmatpush.bf16.msra.mxu0 %v2438_v61  ;;  %1420 = vmatpush.bf16.msra.mxu1 %v2440_v62 }
 0x1f6   : > { %1445 = vmatpush.bf16.msra.mxu2 %v2442_v63  ;;  %1470 = vmatpush.bf16.msra.mxu3 %v2444_v0 }
 0x1ff   : > { %2298 = vmatmul.msk.bf16.vlgmr.msrb.gmra.mxu0 %vm1038_vm1, %v1076_v56  ;;  %2307 = vmatmul.msk.bf16.vlgmr.msrb.gmra.mxu1 %vm1038_vm1, %v1076_v56 }
 0x200   : > { %2316 = vmatmul.msk.bf16.vlgmr.msrb.gmra.mxu2 %vm1038_vm1, %v1076_v56  ;;  %2325 = vmatmul.msk.bf16.vlgmr.msrb.gmra.mxu3 %vm1038_vm1, %v1076_v56 }
 0x20f   : > { %2334 = vmatmul.msk.bf16.vlgmr.msra.gmra.mxu0 %vm1038_vm1, %v1076_v56  ;;  %2343 = vmatmul.msk.bf16.vlgmr.msra.gmra.mxu1 %vm1038_vm1, %v1076_v56 }
 0x210   : > { %2352 = vmatmul.msk.bf16.vlgmr.msra.gmra.mxu2 %vm1038_vm1, %v1076_v56  ;;  %2361 = vmatmul.msk.bf16.vlgmr.msra.gmra.mxu3 %vm1038_vm1, %v1076_v56  ;;  %v2540_v56 = vld [vmem:[%s2907_s26 + $0x3] ss:$0 sm:$0xff] }
 0x26c   : > { %v1133_v1 = vpop.f32.mrf.mxu0  ;;  %v1158_v2 = vpop.f32.mrf.mxu1 }
 0x26d   : > { %v1134_v27 = vadd.f32 %v2529_v16, %v1133_v1  ;;  %v1159_v28 = vadd.f32 %v2530_v20, %v1158_v2 }
 0x26f   : > { %v1476_v37 = vpack.c.bf16 %v1134_v27, %v1134_v27  ;;  %v1477_v38 = vpack.c.bf16 %v1159_v28, %v1159_v28 }
 0x273   : > { %v1183_v3 = vpop.f32.mrf.mxu2  ;;  %v1208_v4 = vpop.f32.mrf.mxu3 }
 0x274   : > { %v1135_v5 = vpop.f32.mrf.mxu0  ;;  %v1160_v6 = vpop.f32.mrf.mxu1  ;;  %v1184_v43 = vadd.f32 %v2531_v33, %v1183_v3  ;;  %v1209_v44 = vadd.f32 %v2532_v34, %v1208_v4 }
 0x276   : > { %v1478_v51 = vpack.c.bf16 %v1184_v43, %v1184_v43  ;;  %v1479_v52 = vpack.c.bf16 %v1209_v44, %v1209_v44 }
 0x27b   : > { %v1185_v9 = vpop.f32.mrf.mxu2  ;;  %v1210_v10 = vpop.f32.mrf.mxu3 }
 0x27c   : > { %v1265_v12 = vpop.f32.mrf.mxu0  ;;  %v1290_v13 = vpop.f32.mrf.mxu1  ;;  %v1565_v9 = vld [vmem:[%s3270_s2] sm:$0xff] }
 0x27d   : > { %v1266_v14 = vadd.f32 %v2533_v7, %v1265_v12  ;;  %v1291_v15 = vadd.f32 %v2534_v8, %v1290_v13 }
 0x27f   : > { %v1480_v17 = vpack.c.bf16 %v1266_v14, %v1266_v14  ;;  %v1481_v18 = vpack.c.bf16 %v1291_v15, %v1291_v15 }
 0x281   : > { %v1489_v23 = vsel %vm1484_vm6, %v1480_v17, 0  ;;  %v1508_v24 = vsel %vm1484_vm6, %v1481_v18, 0 }
 0x282   : > { %1498 = vmatpush.bf16.xpose.msrb.mxu0 %v1489_v23  ;;  %1517 = vmatpush.bf16.xpose.msrb.mxu1 %v1508_v24 }
 0x283   : > { %v1315_v25 = vpop.f32.mrf.mxu2  ;;  %v1340_v26 = vpop.f32.mrf.mxu3 }
 0x284   : > { %v1316_v29 = vadd.f32 %v2535_v21, %v1315_v25  ;;  %v1341_v30 = vadd.f32 %v2536_v22, %v1340_v26  ;;  %v1267_v31 = vpop.f32.mrf.mxu0  ;;  %v1292_v32 = vpop.f32.mrf.mxu1 }
 0x286   : > { %v1482_v35 = vpack.c.bf16 %v1316_v29, %v1316_v29  ;;  %v1483_v36 = vpack.c.bf16 %v1341_v30, %v1341_v30 }
 0x288   : > { %v1527_v39 = vsel %vm1484_vm6, %v1482_v35, 0  ;;  %v1546_v40 = vsel %vm1484_vm6, %v1483_v36, 0 }
 0x289   : > { %1536 = vmatpush.bf16.xpose.msrb.mxu2 %v1527_v39  ;;  %1555 = vmatpush.bf16.xpose.msrb.mxu3 %v1546_v40 }
 0x28a   : > { %2362 = vmatmul.msk.bf16.vlgmr.msrb.gmra.mxu0 %vm1484_vm6, %v1476_v37  ;;  %2363 = vmatmul.msk.bf16.vlgmr.msrb.gmra.mxu1 %vm1484_vm6, %v1477_v38 }
 0x28b   : > { %v1317_v45 = vpop.f32.mrf.mxu2  ;;  %v1342_v46 = vpop.f32.mrf.mxu3 }
 0x28c   : > { %v1397_v47 = vpop.f32.mrf.mxu0  ;;  %v1422_v48 = vpop.f32.mrf.mxu1 }
 0x28d   : > { %v1398_v49 = vadd.f32 %v2537_v41, %v1397_v47  ;;  %v1423_v50 = vadd.f32 %v2538_v42, %v1422_v48 }
 0x28f   : > { %v1618_v53 = vpack.c.bf16 %v1398_v49, %v1398_v49  ;;  %v1619_v54 = vpack.c.bf16 %v1423_v50, %v1423_v50 }
 0x290   : > { %2364 = vmatmul.msk.bf16.vlgmr.msrb.gmra.mxu2 %vm1484_vm6, %v1478_v51  ;;  %2365 = vmatmul.msk.bf16.vlgmr.msrb.gmra.mxu3 %vm1484_vm6, %v1479_v52 }
 0x291   : > { %v1627_v57 = vsel %vm1625_vm7, %v1618_v53, 0  ;;  %v1646_v58 = vsel %vm1625_vm7, %v1619_v54, 0 }
 0x292   : > { %1636 = vmatpush.bf16.msra.mxu0 %v1627_v57  ;;  %1655 = vmatpush.bf16.msra.mxu1 %v1646_v58 }
 0x293   : > { %v1447_v59 = vpop.f32.mrf.mxu2  ;;  %v1472_v60 = vpop.f32.mrf.mxu3 }
 0x294   : > { %v1448_v61 = vadd.f32 %v2539_v55, %v1447_v59  ;;  %v1473_v62 = vadd.f32 %v2540_v56, %v1472_v60  ;;  %v1399_v63 = vpop.f32.mrf.mxu0  ;;  %v1424_v0 = vpop.f32.mrf.mxu1 }
 0x296   : > { %v1620_v1 = vpack.c.bf16 %v1448_v61, %v1448_v61  ;;  %v1621_v2 = vpack.c.bf16 %v1473_v62, %v1473_v62 }
 0x298   : > { %v1665_v3 = vsel %vm1625_vm7, %v1620_v1, 0  ;;  %v1684_v4 = vsel %vm1625_vm7, %v1621_v2, 0  ;;  %v1703_v2 = vld [vmem:[%s2913_s27] sm:$0xf] }
 0x299   : > { %1674 = vmatpush.bf16.msra.mxu2 %v1665_v3  ;;  %1693 = vmatpush.bf16.msra.mxu3 %v1684_v4  ;;  %v1711_v3 = vsel %vm1625_vm7, %v1703_v2, 0  ;;  %v1705_v4 = vld [vmem:[%s2913_s27 + $0x8] sm:$0xf] }
 0x29a   : > { %1720 = vmatpush.bf16.msrb.mxu0 %v1711_v3  ;;  %v2449_v2 = vld [vmem:[%s2944_s15 + $0x8] sm:$0xff]  ;;  %v2448_v3 = vld [vmem:[%s2944_s15] sm:$0xff] }
 0x29b   : > { %v1449_v5 = vpop.f32.mrf.mxu2  ;;  %v1474_v6 = vpop.f32.mrf.mxu3 }
 0x29c   : > { %v1749_v5 = vsel %vm1625_vm7, %v1705_v4, 0  ;;  %v1704_v6 = vld [vmem:[%s2913_s27 + $0x4] sm:$0xf]  ;;  %v2544_v4 = vld [vmem:[%s978_s12] ss:$0 sm:$0xff] }
 0x29d   : > { %1758 = vmatpush.bf16.msrb.mxu2 %v1749_v5 }
 0x307   : > { %v1500_v7 = vpop.f32.mrf.mxu0  ;;  %v1519_v8 = vpop.f32.mrf.mxu1 }
 0x308   : > { %v1561_v10 = vmul.f32 0.35355338, %v1500_v7  ;;  %v1562_v13 = vmul.f32 0.35355338, %v1519_v8  ;;  %v1730_v7 = vsel %vm1625_vm7, %v1704_v6, 0 }
 0x309   : > { %1739 = vmatpush.bf16.msrb.mxu1 %v1730_v7  ;;  %v1706_v8 = vld [vmem:[%s2913_s27 + $0xc] sm:$0xf] }
 0x30a   : > { %v1566_v12 = vadd.f32 %v1565_v9, %v1561_v10  ;;  %v1567_v17 = vadd.f32 %v1565_v9, %v1562_v13 }
 0x30c   : > { %v1570_v14 = vsel %vm1484_vm6, %v1566_v12, -inf  ;;  %v1573_v22 = vsel %vm1484_vm6, %v1567_v17, -inf }
 0x30d   : > { %1571 = vmax.xlane.f32.xlu2 %v1570_v14 }
 0x30f   : > { %v1502_v15 = vpop.f32.mrf.mxu0  ;;  %v1521_v16 = vpop.f32.mrf.mxu1 }
 0x313   : > { %v1538_v18 = vpop.f32.mrf.mxu2  ;;  %v1557_v20 = vpop.f32.mrf.mxu3 }
 0x314   : > { %v1563_v21 = vmul.f32 0.35355338, %v1538_v18  ;;  %v1564_v24 = vmul.f32 0.35355338, %v1557_v20 }
 0x315   : > { %1574 = vmax.xlane.f32.xlu2 %v1573_v22 }
 0x316   : > { %v1568_v23 = vadd.f32 %v1565_v9, %v1563_v21  ;;  %v1569_v28 = vadd.f32 %v1565_v9, %v1564_v24  ;;  %v1768_v9 = vsel %vm1625_vm7, %v1706_v8, 0 }
 0x317   : > { %1777 = vmatpush.bf16.msrb.mxu3 %v1768_v9 }
 0x318   : > { %v1576_v25 = vsel %vm1484_vm6, %v1568_v23, -inf  ;;  %v1579_v29 = vsel %vm1484_vm6, %v1569_v28, -inf }
 0x319   : > { %1577 = vmax.xlane.f32.xlu1 %v1576_v25 }
 0x31b   : > { %v1540_v26 = vpop.f32.mrf.mxu2  ;;  %v1559_v27 = vpop.f32.mrf.mxu3 }
 0x321   : > { %1580 = vmax.xlane.f32.xlu1 %v1579_v29 }
 0x380   : > { %v1572_v30 = vpop.xlane.xlu2 %1571 }
 0x381   : > { %v1582_v31 = vsub.f32 %v1566_v12, %v1572_v30 }
 0x383   : > { %v1586_v32 = vmul.f32 1.442695, %v1582_v31 }
 0x385   : > { %2550 = vpow2.f32 %v1586_v32 }
 0x388   : > { %v1575_v34 = vpop.xlane.xlu2 %1574 }
 0x389   : > { %v1583_v38 = vsub.f32 %v1567_v17, %v1575_v34 }
 0x38b   : > { %v2551_v33 = vpop.eup %2550  ;;  %v1588_v40 = vmul.f32 1.442695, %v1583_v38 }
 0x38c   : > { %v1578_v35 = vpop.xlane.xlu1 %1577  ;;  %v1594_v36 = vsel %vm1484_vm6, %v2551_v33, 0.0 }
 0x38d   : > { %v1584_v37 = vsub.f32 %v1568_v23, %v1578_v35  ;;  %1595 = vadd.xlane.f32.xlu2 %v1594_v36  ;;  %v2541_v36 = vld [vmem:[%s3272_s21] ss:$0 sm:$0xff] }
 0x38f   : > { %v1590_v39 = vmul.f32 1.442695, %v1584_v37 }
 0x391   : > { %2552 = vpow2.f32 %v1590_v39 }
 0x392   : > { %2554 = vpow2.f32 %v1588_v40 }
 0x394   : > { %v1581_v41 = vpop.xlane.xlu1 %1580 }
 0x395   : > { %v1585_v42 = vsub.f32 %v1569_v28, %v1581_v41 }
 0x397   : > { %v2553_v43 = vpop.eup %2552  ;;  %v1592_v44 = vmul.f32 1.442695, %v1585_v42 }
 0x398   : > { %v1600_v45 = vsel %vm1484_vm6, %v2553_v43, 0.0  ;;  %v2555_v46 = vpop.eup %2554 }
 0x399   : > { %2556 = vpow2.f32 %v1592_v44  ;;  %1601 = vadd.xlane.f32.xlu0 %v1600_v45  ;;  %v1597_v49 = vsel %vm1484_vm6, %v2555_v46, 0.0 }
 0x39f   : > { %v2557_v47 = vpop.eup %2556 }
 0x3a0   : > { %v1603_v48 = vsel %vm1484_vm6, %v2557_v47, 0.0 }
 0x3a1   : > { %1604 = vadd.xlane.f32.xlu1 %v1603_v48  ;;  %1598 = vadd.xlane.f32.xlu0 %v1597_v49  ;;  %v2447_v48 = vld [vmem:[%s2930_s11 + $0x8] sm:$0xff]  ;;  %v2446_v49 = vld [vmem:[%s2930_s11] sm:$0xff] }
 0x400   : > { %v1596_v50 = vpop.xlane.xlu2 %1595 }
 0x401   : > { %2558 = vrcp.f32 %v1596_v50  ;;  %v2451_v50 = vld [vmem:[%s2944_s15 + $0x18] sm:$0xff] }
 0x407   : > { %v2559_v51 = vpop.eup %2558 }
 0x408   : > { %v1610_v52 = vmul.f32 %v2559_v51, %v2551_v33 }
 0x40a   : > { %v1614_v53 = vpack.c.bf16 %v1610_v52, %v1610_v52  ;;  %v2450_v52 = vld [vmem:[%s2944_s15 + $0x10] sm:$0xff]  ;;  %s3276_s15 = sld [smem:[#allocation9_spill]] }
 0x40c   : > { %v1602_v54 = vpop.xlane.xlu0 %1601  ;;  %2366 = vmatmul.msk.bf16.vlgmr.msra.gmra.mxu0 %vm1484_vm6, %v1614_v53 }
 0x40d   : > { %2560 = vrcp.f32 %v1602_v54  ;;  %1858 = vmatpush.bf16.msra.mxu0 %v2447_v48 }
 0x410   : > { %p2400_p1 = scmp.ne.s32.totalorder %s3276_s15, 1 }
 0x411   : > { %1859 = vmatpush.bf16.msra.mxu0 %v2446_v49  ;;  %s3277_s8 = sld [smem:[#allocation38_spill]] (!%p2400_p1) }
 0x412   : > { %s3278_s26 = sld [smem:[#allocation39_spill]] (!%p2400_p1) }
 0x413   : > { %v2561_v55 = vpop.eup %2560 }
 0x414   : > { %v1612_v56 = vmul.f32 %v2561_v55, %v2553_v43  ;;  %v1605_v57 = vpop.xlane.xlu1 %1604  ;;  %v1599_v58 = vpop.xlane.xlu0 %1598 }
 0x415   : > { %2562 = vrcp.f32 %v1605_v57 }
 0x416   : > { %v1616_v59 = vpack.c.bf16 %v1612_v56, %v1612_v56  ;;  %2564 = vrcp.f32 %v1599_v58 }
 0x418   : > { %2368 = vmatmul.msk.bf16.vlgmr.msra.gmra.mxu2 %vm1484_vm6, %v1616_v59 }
 0x41b   : > { %v2563_v60 = vpop.eup %2562 }
 0x41c   : > { %v2565_v61 = vpop.eup %2564  ;;  %v1613_v62 = vmul.f32 %v2563_v60, %v2557_v47 }
 0x41d   : > { %v1611_v63 = vmul.f32 %v2565_v61, %v2555_v46 }
 0x41e   : > { %v1617_v0 = vpack.c.bf16 %v1613_v62, %v1613_v62  ;;  %v2543_v62 = vld [vmem:[%s970_s22] ss:$0 sm:$0xff] }
 0x41f   : > { %v1615_v1 = vpack.c.bf16 %v1611_v63, %v1611_v63 }
 0x420   : > { %2369 = vmatmul.msk.bf16.vlgmr.msra.gmra.mxu3 %vm1484_vm6, %v1617_v0 }
 0x421   : > { %2367 = vmatmul.msk.bf16.vlgmr.msra.gmra.mxu1 %vm1484_vm6, %v1615_v1 }
 0x422   : > { %1911 = vmatpush.bf16.msra.mxu1 %v2451_v50 }
 0x426   : > { %1912 = vmatpush.bf16.msra.mxu1 %v2450_v52 }
 0x42a   : > { %1913 = vmatpush.bf16.msra.mxu1 %v2449_v2 }
 0x42e   : > { %1914 = vmatpush.bf16.msra.mxu1 %v2448_v3 }
 0x489   : > { %v1638_v10 = vpop.f32.mrf.mxu0 }
 0x48a   : > { %v1699_v12 = vpack.c.bf16 %v1638_v10, %v1638_v10  ;;  %v2545_v10 = vld [vmem:[%s986_s14] ss:$0 sm:$0xff] }
 0x48c   : > { %2370 = vmatmul.msk.bf16.vlgmr.msrb.gmra.mxu0 %vm1484_vm6, %v1699_v12 }
 0x491   : > { %v1640_v13 = vpop.f32.mrf.mxu0 }
 0x49b   : > { %v1676_v14 = vpop.f32.mrf.mxu2 }
 0x49c   : > { %v1701_v15 = vpack.c.bf16 %v1676_v14, %v1676_v14 }
 0x49e   : > { %v1657_v16 = vpop.f32.mrf.mxu1  ;;  %2372 = vmatmul.msk.bf16.vlgmr.msrb.gmra.mxu2 %vm1484_vm6, %v1701_v15 }
 0x49f   : > { %v1700_v17 = vpack.c.bf16 %v1657_v16, %v1657_v16 }
 0x4a1   : > { %2371 = vmatmul.msk.bf16.vlgmr.msrb.gmra.mxu1 %vm1484_vm6, %v1700_v17 }
 0x4a3   : > { %v1678_v18 = vpop.f32.mrf.mxu2  ;;  %v1695_v20 = vpop.f32.mrf.mxu3 }
 0x4a4   : > { %v1702_v21 = vpack.c.bf16 %v1695_v20, %v1695_v20 }
 0x4a6   : > { %v1659_v22 = vpop.f32.mrf.mxu1  ;;  %2373 = vmatmul.msk.bf16.vlgmr.msrb.gmra.mxu3 %vm1484_vm6, %v1702_v21 }
 0x4ab   : > { %v1697_v23 = vpop.f32.mrf.mxu3 }
 0x509   : > { %v1722_v24 = vpop.f32.mrf.mxu0 }
 0x50a   : > { %v1783_v29 = vsel %vm1038_vm1, %v1722_v24, 0.0 }
 0x511   : > { %v1724_v25 = vpop.f32.mrf.mxu0 }
 0x51e   : > { %v1741_v26 = vpop.f32.mrf.mxu1 }
 0x51f   : > { %v1784_v28 = vsel %vm1038_vm1, %v1741_v26, 0.0 }
 0x520   : > { %v1785_v32 = vadd.f32 %v1784_v28, %v1783_v29 }
 0x521   : > { %v1760_v27 = vpop.f32.mrf.mxu2 }
 0x522   : > { %v1786_v30 = vsel %vm1038_vm1, %v1760_v27, 0.0 }
 0x523   : > { %v1787_v33 = vadd.f32 %v1786_v30, %v1785_v32 }
 0x526   : > { %v1743_v31 = vpop.f32.mrf.mxu1 }
 0x529   : > { %v1762_v34 = vpop.f32.mrf.mxu2  ;;  %v1779_v35 = vpop.f32.mrf.mxu3 }
 0x52a   : > { %v1788_v37 = vsel %vm1038_vm1, %v1779_v35, 0.0 }
 0x52b   : > { %v1789_v38 = vadd.f32 %v1788_v37, %v1787_v33 }
 0x52d   : > { %v1794_v39 = vadd.f32 %v2541_v36, %v1789_v38 }
 0x52f   : > { %v1795_v40 = vadd.f32 %v1794_v39, %v2960_v11 }
 0x531   : > { %v1781_v41 = vpop.f32.mrf.mxu3  ;;  %v1798_v42 = vsel %vm1038_vm1, %v1795_v40, 0.0 }
 0x532   : > { %1799 = vadd.xlane.f32.xlu1 %v1798_v42 }
 0x5a5   : > { %v1800_v43 = vpop.xlane.xlu1 %1799 }
 0x5a6   : > { %v1801_v44 = vmul.f32 %v1800_v43, %v2964_v19 }
 0x5a8   : > { %v1802_v45 = vsub.f32 %v1795_v40, %v1801_v44 }
 0x5aa   : > { %v1803_v46 = vmul.f32 %v1802_v45, %v1802_v45 }
 0x5ac   : > { %v1804_v47 = vsel %vm1038_vm1, %v1803_v46, 0.0 }
 0x5ad   : > { %1805 = vadd.xlane.f32.xlu2 %v1804_v47 }
 0x620   : > { %v1806_v11 = vpop.xlane.xlu2 %1805 }
 0x621   : > { %v1807_v51 = vmul.f32 %v1806_v11, %v2964_v19  ;;  %v2542_v19 = vld [vmem:[%s3274_s10] ss:$0 sm:$0xff] }
 0x623   : > { %v1808_v53 = vadd.f32 1e-05, %v1807_v51 }
 0x625   : > { %2566 = vrsqrt.f32 %v1808_v53  ;;  %vm1815_vm9 = vweird.f32 %v1808_v53 }
 0x62b   : > { %v2567_v54 = vpop.eup %2566 }
 0x62c   : > { %v1810_v55 = vmul.f32 %v2567_v54, %v1808_v53  ;;  %vm1816_vm8 = vweird.f32 %v2567_v54 }
 0x62d   : > { %vm1817_vm10 = vmor %vm1815_vm9, %vm1816_vm8 }
 0x62e   : > { %v1811_v56 = vmul.f32 %v2567_v54, %v1810_v55 }
 0x630   : > { %v1812_v57 = vmul.f32 0.5, %v1811_v56 }
 0x632   : > { %v1813_v58 = vsub.f32 1.5, %v1812_v57 }
 0x634   : > { %v1814_v59 = vmul.f32 %v2567_v54, %v1813_v58 }
 0x636   : > { %v1818_v60 = vsel %vm1817_vm10, %v2567_v54, %v1814_v59 }
 0x637   : > { %v1819_v61 = vmul.f32 %v1818_v60, %v1802_v45 }
 0x639   : > { %v1823_v63 = vmul.f32 %v2542_v19, %v1819_v61 }
 0x63b   : > { %v1827_v0 = vadd.f32 %v2543_v62, %v1823_v63 }
 0x63d   : > { %v1828_v1 = vpack.c.bf16 %v1827_v0, %v1827_v0 }
 0x63f   : > { %2382 = vmatmul.msk.bf16.vlgmr.msra.gmra.mxu0 %vm1038_vm1, %v1828_v1 }
 0x6bc   : > { %v1861_v5 = vpop.f32.mrf.mxu0 }
 0x6bd   : > { %v1862_v6 = vadd.f32 %v2544_v4, %v1861_v5 }
 0x6bf   : > { %v1865_v7 = vmax.f32 %v1862_v6, 0.0 }
 0x6c1   : > { %v1866_v8 = vpack.c.bf16 %v1865_v7, %v1865_v7 }
 0x6c3   : > { %2399 = vmatmul.msk.bf16.vlgmr.msra.gmra.mxu1 %vm1903_vm11, %v1866_v8 }
 0x6c4   : > { %v1863_v9 = vpop.f32.mrf.mxu0 }
 0x740   : > { %v1916_v12 = vpop.f32.mrf.mxu1 }
 0x741   : > { %v1917_v13 = vadd.f32 %v2545_v10, %v1916_v12 }
 0x743   : > { %v1920_v14 = vadd.f32 %v1917_v13, %v1795_v40 }
 0x744   : > { %1925 = sbr.rel (%p2400_p1) target bundleno = 2007 (0x7d7), region = 120 }
 0x745   : > { %1921 = vst.msk [vmem:[#allocation2] sm:$0xff] %vm1038_vm1, %v1920_v14 }
 0x748   : > { %v1918_v15 = vpop.f32.mrf.mxu1 }
 0x749   : > { %v2453_v16 = vld [vmem:[%s3277_s8 + $0x8] sm:$0xff]  ;;  %v2452_v17 = vld [vmem:[%s3277_s8] sm:$0xff]  ;;  %v1926_v18 = vpack.c.bf16 %v1920_v14, %v1920_v14  ;;  %vm1963_vm12 = vcmask 125952  }
 0x74a   : > { %1956 = vmatpush.bf16.msra.mxu0 %v2453_v16  ;;  %v2568_v20 = vld [vmem:[%s3278_s26] ss:$0 sm:$0xff] }
 0x74e   : > { %1957 = vmatpush.bf16.msra.mxu0 %v2452_v17 }
 0x751   : > { %2409 = vmatmul.msk.bf16.vlgmr.msra.gmra.mxu0 %vm1038_vm1, %v1926_v18 }
 0x7ce   : > { %v1959_v21 = vpop.f32.mrf.mxu0 }
 0x7cf   : > { %v1960_v22 = vadd.f32 %v2568_v20, %v1959_v21 }
 0x7d1   : > { %1964 = vst.msk [vmem:[%s919_s19] sm:$0xf] %vm1963_vm12, %v1960_v22 }
 0x7d6   : > { %v1961_v23 = vpop.f32.mrf.mxu0 }
 0x7d7 PF: > { %s3279_s2 = sld [smem:[#allocation10_spill]]  ;;  %s1978_s10 = sshll.u32 %s919_s19, 4  ;;  %s1979_s10 = int_to_ptr.vmem [resolvable:$true] %s1978_s10 }
 0x7d8   : > { %s3280_s27 = sld [smem:[#allocation7_spill]] }
 0x7d9   : > { %s3282_s9 = sld [smem:[#allocation40_spill]] }
 0x7dd   : > { %s2411_s29 = sshll.u32 %s3279_s2, 2 }
 0x7de   : > { %s3283_s3 = sand.u32 1, %s3280_s27  }
 0x7df   : > { %s1976_s5 = scalar_lea.hbm %s3282_s9, %s2411_s29  ;;  %s1966_s30 = scalar_lea.sflag [#allocation4], %s3283_s3 }
 0x7e0   : > { %s1980_s7 = sshll.u32 %s1976_s5, 4  ;;  %s2589_s15 = scalar_lea.hbm %s3282_s9, 8  ;;  %s1981_s7 = int_to_ptr.hbm [resolvable:$true] %s1980_s7 }
 0x7e1   : > { %s2583_s24 = sshra.s32 %s1981_s7, 4  ;;  %s2584_s24 = int_to_ptr.hbm [resolvable:$true] %s2583_s24 }
 0x7e2   : > { %s2585_s22 = scalar_lea.hbm %s2584_s24, 4  ;;  %p2590_p6 = scmp.lt.s32.totalorder %s2584_s24, %s3282_s9 }
 0x7e3   : > { %p2586_p2 = scmp.ne.s32.totalorder %s2584_s24, %s2585_s22  ;;  %p2591_p7 = scmp.lt.s32.totalorder %s2589_s15, %s2585_s22 }
 0x7e5   : > { %p2587_p4 = pnand %p2586_p2, %p2835_p3  ;;  %p2592_p8 = por %p2591_p7, %p2590_p6 }
 0x7e7   : > { %p2588_p5 = pneg %p2587_p4 }
 0x7e9   : > { %p2593_p10 = pnand %p2592_p8, %p2588_p5 }
 0x7eb   : > { %2596 = shalt.err (!%p2593_p10)
}
 0x7ec   : > { %2454 = dma.vmem_to_hbm [thread:$0]  (%p2835_p3), %s1979_s10, 64, %s1981_s7, %s1966_s30  }
 0x7ed PF: > { %s3284_s1 = sld [smem:[#allocation13_spill]] }
 0x7ee   : > { %s3285_s19 = sld [smem:[#allocation6_spill]] }
 0x7f3   : > { %p2460_p11 = scmp.ge.s32.totalorder %s3284_s1, 2 }
 0x7f4   : > { %s1992_s0 = sand.u32 1, %s3285_s19  }
 0x7f5   : > { %p2457_p12 = pnand %p2460_p11, %p2845_p9  ;;  %s1993_s14 = scalar_lea.sflag [#allocation4], %s1992_s0 }
 0x7f7   : > { %p2458_p13 = pneg %p2457_p12 }
 0x7f9   : > { %2630 = dma.done.wait (%p2458_p13), %s1993_s14, 64  }
 0x7fa   : > { %2632 = vsyncadd (%p2458_p13), %s1993_s14, 4294967232  ;;  %s36_s2 = sadd.s32 1, %s3284_s1   ;;  %s3287_s4 = sld [smem:[#allocation7_spill]] }
 0x7fb   : > { %p33_p0 = scmp.ge.s32.totalorder %s36_s2, 6   ;;  %s3288_s30 = sld [smem:[#allocation8_spill]] }
 0x7fc   : > { %s3289_s24 = sld [smem:[#allocation18_spill]] }
 0x7fd   : > { %s3290_s25 = sld [smem:[#allocation11_spill]]  ;;  %35 = sbr.rel (!%p33_p0) target bundleno = 27 (0x1b), region = 203 }
 0x7fe   : > { %s3291_s5 = sld [smem:[#allocation12_spill]] }
 0x7ff   : > { %s3292_s1 = sld [smem:[#allocation14_spill]] }
 0x800   : > { %s3293_s26 = sld [smem:[#allocation16_spill]] }
 0x802   :  { %1999 = vsyncpa [#allocation4], 1 }
 0x803   :  { %2001 = vsyncpa [#allocation4 + $0x1], 1 }

</bundles_post_ra>
